<compile_context>
chip_gen: v7x
topology: tpu7x:2x2x1
jax: 0.10.0
libtpu: 0.0.40
codegen_flags: <defaults>
</compile_context>

<pallas_src>
import functools
from math import log2

import jax
import jax.numpy as jnp
from jax.experimental import pallas as pl
from jax.experimental.pallas import tpu as pltpu

LEAKY_SLOPE = 0.2   # TODO(synk): leaky_relu() helper undefined in source; assume slope 0.2.
EPS = 1e-8


# ---------------------------------------------------------------------------
# Pallas kernel: fused modulated 3x3x3 conv for one (batch, depth-slice)
# ---------------------------------------------------------------------------
def _conv3x3_kernel(*refs, H, W, apply_mod, apply_demod, apply_noise,
                    act_slope, fuse_feature):
    it = iter(refs)
    x0_ref = next(it)                       # (1,1,H+2,W+2,Cin) bf16  (depth slice d)
    x1_ref = next(it)                       # depth slice d+1
    x2_ref = next(it)                       # depth slice d+2
    w_ref = next(it)                        # (27, Cin, Cout) bf16 shared weight
    smod_ref = next(it) if apply_mod else None      # (1, Cin, 1) f32  (style+1)
    dsc_ref = next(it) if apply_demod else None     # (1, 1, Cout) f32 precomputed rsqrt
    nz_ref = next(it) if apply_noise else None      # (1, 1, H*W, 1) f32 noise field
    nw_ref = next(it) if apply_noise else None      # (1, Cout) f32 to_noise weight
    nb_ref = next(it)                               # (1, Cout) f32 to_noise bias / conv bias
    if fuse_feature:
        fsty_ref = next(it)                 # (1, 1, Cout) f32  (feat style + 1)
        fw_ref = next(it)                   # (Cout, Fdim) bf16
        pf_ref = next(it)                   # (1, 1, H*W, Fdim) f32 prev feature
    o_ref = next(it)                        # (1, 1, H*W, Cout) bf16
    f_ref = next(it) if fuse_feature else None      # (1, 1, H*W, Fdim) f32

    Cout = o_ref.shape[-1]
    Npix = H * W

    # Modulate the weight (K*Cout work, not N*K); keep bf16 MXU operands.
    w = w_ref[...]                                              # (27, Cin, Cout) bf16
    if apply_mod:
        w = (w * smod_ref[0]).astype(jnp.bfloat16)              # broadcast (Cin,1)

    acc = jnp.zeros((Npix, Cout), jnp.float32)
    for kd, xr in enumerate((x0_ref, x1_ref, x2_ref)):
        xs = xr[0, 0]                                           # (H+2, W+2, Cin) bf16
        for kh in range(3):
            for kw in range(3):
                patch = xs[kh:kh + H, kw:kw + W, :].reshape(Npix, -1)
                acc = acc + jnp.dot(patch, w[kd * 9 + kh * 3 + kw],
                                    preferred_element_type=jnp.float32)

    # Epilogue in f32.
    if apply_demod:
        acc = acc * dsc_ref[0]                                  # (1, Cout)
    if apply_noise:
        acc = acc + nz_ref[0, 0] * nw_ref[...] + nb_ref[...]    # rank-1 noise addend
    else:
        acc = acc + nb_ref[...]                                 # plain conv bias
    if act_slope is not None:
        acc = jnp.where(acc >= 0.0, acc, acc * act_slope)       # leaky relu
    o_ref[0, 0] = acc.astype(o_ref.dtype)

    if fuse_feature:
        # FeatureBlock 1x1x1 Conv3DMod (demod=False) fused while x is resident.
        xf = (acc * fsty_ref[0]).astype(jnp.bfloat16)           # modulate activations
        feat = jnp.dot(xf, fw_ref[...], preferred_element_type=jnp.float32)
        f_ref[0, 0] = (feat + pf_ref[0, 0]).astype(f_ref.dtype)


def modulated_conv3x3(x, w27, *, style_mod=None, demod_scale=None,
                      noise=None, noise_w=None, noise_b=None, bias=None,
                      feat_style=None, feat_w=None, prev_feat=None,
                      act_slope=None):
    """Fused 'same'-padded modulated 3x3x3 conv (+ noise + leaky relu
    [+ fused 1x1x1 feature conv]).

    x: (B,D,H,W,Cin); w27: (27,Cin,Cout) tap-major; style_mod/demod_scale:
    (B,Cin)/(B,Cout); noise: (B,D,H,W); noise_w/noise_b/bias: (Cout,);
    feat_style: (B,Cout); feat_w: (Cout,Fdim); prev_feat: (B,D,H,W,Fdim).
    """
    B, D, H, W, Cin = x.shape
    K, Cin_w, Cout = w27.shape
    assert K == 27 and Cin_w == Cin
    HW = H * W
    Hp, Wp = H + 2, W + 2

    apply_mod = style_mod is not None
    apply_demod = demod_scale is not None
    apply_noise = noise is not None
    fuse_feature = feat_w is not None

    xp = jnp.pad(x.astype(jnp.bfloat16),
                 ((0, 0), (1, 1), (1, 1), (1, 1), (0, 0)))      # (B, D+2, H+2, W+2, Cin)
    w_bf = w27.astype(jnp.bfloat16)

    inputs = [xp, xp, xp, w_bf]
    in_specs = [
        pl.BlockSpec((1, 1, Hp, Wp, Cin), lambda b, d: (b, d, 0, 0, 0)),
        pl.BlockSpec((1, 1, Hp, Wp, Cin), lambda b, d: (b, d + 1, 0, 0, 0)),
        pl.BlockSpec((1, 1, Hp, Wp, Cin), lambda b, d: (b, d + 2, 0, 0, 0)),
        pl.BlockSpec((27, Cin, Cout), lambda b, d: (0, 0, 0)),
    ]
    if apply_mod:
        inputs.append(style_mod.astype(jnp.float32).reshape(B, Cin, 1))
        in_specs.append(pl.BlockSpec((1, Cin, 1), lambda b, d: (b, 0, 0)))
    if apply_demod:
        inputs.append(demod_scale.astype(jnp.float32).reshape(B, 1, Cout))
        in_specs.append(pl.BlockSpec((1, 1, Cout), lambda b, d: (b, 0, 0)))
    if apply_noise:
        inputs.append(noise.astype(jnp.float32).reshape(B, D, HW, 1))
        in_specs.append(pl.BlockSpec((1, 1, HW, 1), lambda b, d: (b, d, 0, 0)))
        inputs.append(noise_w.astype(jnp.float32).reshape(1, Cout))
        in_specs.append(pl.BlockSpec((1, Cout), lambda b, d: (0, 0)))
        add_b = noise_b
    else:
        add_b = bias
    inputs.append(add_b.astype(jnp.float32).reshape(1, Cout))
    in_specs.append(pl.BlockSpec((1, Cout), lambda b, d: (0, 0)))

    out_shape = [jax.ShapeDtypeStruct((B, D, HW, Cout), jnp.bfloat16)]
    out_specs = [pl.BlockSpec((1, 1, HW, Cout), lambda b, d: (b, d, 0, 0))]
    if fuse_feature:
        Fdim = feat_w.shape[-1]
        inputs.append(feat_style.astype(jnp.float32).reshape(B, 1, Cout))
        in_specs.append(pl.BlockSpec((1, 1, Cout), lambda b, d: (b, 0, 0)))
        inputs.append(feat_w.astype(jnp.bfloat16))
        in_specs.append(pl.BlockSpec((Cout, Fdim), lambda b, d: (0, 0)))
        inputs.append(prev_feat.astype(jnp.float32).reshape(B, D, HW, Fdim))
        in_specs.append(pl.BlockSpec((1, 1, HW, Fdim), lambda b, d: (b, d, 0, 0)))
        out_shape.append(jax.ShapeDtypeStruct((B, D, HW, Fdim), jnp.float32))
        out_specs.append(pl.BlockSpec((1, 1, HW, Fdim), lambda b, d: (b, d, 0, 0)))

    kernel = functools.partial(
        _conv3x3_kernel, H=H, W=W, apply_mod=apply_mod, apply_demod=apply_demod,
        apply_noise=apply_noise, act_slope=act_slope, fuse_feature=fuse_feature)

    outs = pl.pallas_call(
        kernel,
        out_shape=tuple(out_shape),
        grid=(B, D),
        in_specs=in_specs,
        out_specs=tuple(out_specs),
        compiler_params=pltpu.CompilerParams(
            dimension_semantics=("parallel", "parallel"),
            vmem_limit_bytes=48 * 1024 * 1024),
    )(*inputs)

    y = outs[0].reshape(B, D, H, W, Cout)
    if fuse_feature:
        return y, outs[1].reshape(B, D, H, W, feat_w.shape[-1])
    return y


# ---------------------------------------------------------------------------
# JAX glue: trilinear upsample x2 and blur (kept in XLA)
# TODO(synk): upsample+blur could be fused into a single Pallas pass to save
# HBM traffic; left in plain JAX here.
# ---------------------------------------------------------------------------
def _upsample2x_axis(x, axis):
    # nn.Upsample(scale_factor=2, mode='trilinear', align_corners=False), one axis.
    S = x.shape[axis]
    idx = jnp.arange(S)
    x_lo = jnp.take(x, jnp.clip(idx - 1, 0, S - 1), axis=axis)
    x_hi = jnp.take(x, jnp.clip(idx + 1, 0, S - 1), axis=axis)
    even = 0.25 * x_lo + 0.75 * x
    odd = 0.75 * x + 0.25 * x_hi
    out = jnp.stack([even, odd], axis=axis + 1)
    new_shape = list(x.shape)
    new_shape[axis] = 2 * S
    return out.reshape(new_shape)


def upsample2x_trilinear(x):
    for axis in (1, 2, 3):
        x = _upsample2x_axis(x, axis)
    return x


def blur3d(x):
    # TODO(synk): Blur3d is not defined in the reference source; assuming the usual
    # StyleGAN2 normalized binomial blur ([1,2,1]^3 / 64), depthwise, zero padding.
    f = jnp.array([0.25, 0.5, 0.25], jnp.float32)
    for axis in (1, 2, 3):
        S = x.shape[axis]
        pad = [(1, 1) if a == axis else (0, 0) for a in range(x.ndim)]
        xp = jnp.pad(x, pad)

        def sl(off, _axis=axis, _S=S):
            idx = [slice(None)] * x.ndim
            idx[_axis] = slice(off, off + _S)
            return xp[tuple(idx)]

        x = f[0] * sl(0) + f[1] * sl(1) + f[2] * sl(2)
    return x


# ---------------------------------------------------------------------------
# Parameters (deterministic synthetic init; shapes follow the PyTorch module)
# ---------------------------------------------------------------------------
def init_params(key, vol_size, latent_dim, network_capacity, fmap_max, feature_dim):
    num_layers = int(log2(vol_size) - 1)
    filters = [network_capacity * 4 ** (i + 1) for i in range(num_layers)][::-1]
    filters = [min(fmap_max, f) for f in filters]
    init_channels = filters[0]
    filters = [init_channels, *filters]

    keys = iter(jax.random.split(key, 16 + 32 * num_layers))

    def normal(shape, scale=1.0):
        return scale * jax.random.normal(next(keys), shape, jnp.float32)

    params = {
        'num_layers': num_layers,
        'init_channels': init_channels,
        'initial_block': normal((1, init_channels, 4, 4, 4)),     # NCDHW
        # conv weights stored tap-major: (27, Cin, Cout)
        'initial_conv_w': normal((27, init_channels, init_channels),
                                 scale=(2.0 / (27 * init_channels)) ** 0.5),
        'initial_conv_b': normal((init_channels,), scale=0.01),
        'blocks': [],
    }
    for ind, (cin, cout) in enumerate(zip(filters[:-1], filters[1:])):
        blk = {
            'upsample': ind != 0,
            'upsample_feature': ind != num_layers - 1,
            'to_style1_w': normal((latent_dim, cin), scale=latent_dim ** -0.5),
            'to_style1_b': normal((cin,), scale=0.01),
            'to_noise1_w': normal((cout,)),
            'to_noise1_b': normal((cout,), scale=0.01),
            'conv1_w': normal((27, cin, cout), scale=(2.0 / (27 * cout)) ** 0.5),
            'to_style2_w': normal((latent_dim, cout), scale=latent_dim ** -0.5),
            'to_style2_b': normal((cout,), scale=0.01),
            'to_noise2_w': normal((cout,)),
            'to_noise2_b': normal((cout,), scale=0.01),
            'conv2_w': normal((27, cout, cout), scale=(2.0 / (27 * cout)) ** 0.5),
            'feat_style_w': normal((latent_dim, cout), scale=latent_dim ** -0.5),
            'feat_style_b': normal((cout,), scale=0.01),
            'feat_conv_w': normal((cout, feature_dim), scale=cout ** -0.5),   # 1x1x1 conv
        }
        params['blocks'].append(blk)
    return params


# ---------------------------------------------------------------------------
# Forward pass (mirrors Generator.forward / GeneratorBlock / FeatureBlock)
# ---------------------------------------------------------------------------
def generator_block(blk, x, prev_feature, istyle, nkey, *, use_noise):
    if blk['upsample']:
        x = upsample2x_trilinear(x)
    B, D, H, W, Cin = x.shape
    Cout = blk['conv1_w'].shape[-1]
    fdim = blk['feat_conv_w'].shape[-1]

    # noise (torch regenerates randn(B, D, H, W, 1) inside forward)
    if use_noise:
        n = jax.random.normal(nkey, (B, D, H, W), jnp.float32)
    else:
        n = jnp.zeros((B, D, H, W), jnp.float32)
    # torch: to_noiseX(inoise).permute(0,4,3,2,1) -> spatial axes reversed
    nt = jnp.transpose(n, (0, 3, 2, 1))

    # styles / modulation factors + hoisted f32 demodulation scales
    style1 = istyle @ blk['to_style1_w'] + blk['to_style1_b']         # (B, Cin)
    smod1 = style1 + 1.0
    dsc1 = jax.lax.rsqrt((smod1 ** 2) @ jnp.sum(blk['conv1_w'] ** 2, axis=0) + EPS)
    x = modulated_conv3x3(x, blk['conv1_w'], style_mod=smod1, demod_scale=dsc1,
                          noise=nt, noise_w=blk['to_noise1_w'],
                          noise_b=blk['to_noise1_b'], act_slope=LEAKY_SLOPE)

    style2 = istyle @ blk['to_style2_w'] + blk['to_style2_b']         # (B, Cout)
    smod2 = style2 + 1.0
    dsc2 = jax.lax.rsqrt((smod2 ** 2) @ jnp.sum(blk['conv2_w'] ** 2, axis=0) + EPS)

    # FeatureBlock (1x1x1 Conv3DMod, no demod) fused into the conv2 kernel.
    fstyle = istyle @ blk['feat_style_w'] + blk['feat_style_b']       # (B, Cout)
    if prev_feature is None:
        prev_feature = jnp.zeros((B, D, H, W, fdim), jnp.float32)
    x, feat = modulated_conv3x3(
        x, blk['conv2_w'], style_mod=smod2, demod_scale=dsc2,
        noise=nt, noise_w=blk['to_noise2_w'], noise_b=blk['to_noise2_b'],
        act_slope=LEAKY_SLOPE,
        feat_style=fstyle + 1.0, feat_w=blk['feat_conv_w'], prev_feat=prev_feature)

    if blk['upsample_feature']:
        feat = blur3d(upsample2x_trilinear(feat))
    return x, feat


def generator_forward(params, styles, input_noise, noise_key, *, use_noise=True):
    assert input_noise.shape[-1] == 1          # only its shape matters (as in torch)
    B = styles.shape[0]
    C0 = params['init_channels']

    # initial block expand + NCDHW -> channels-last (bf16 activations)
    x = jnp.broadcast_to(params['initial_block'], (B, C0, 4, 4, 4))
    x = jnp.transpose(x, (0, 2, 3, 4, 1)).astype(jnp.bfloat16)        # (B,4,4,4,C0)

    # initial_conv = plain Conv3d(C0, C0, 3, padding=1): no-modulation kernel path
    x = modulated_conv3x3(x, params['initial_conv_w'],
                          bias=params['initial_conv_b'], act_slope=None)

    styles_t = jnp.transpose(styles, (1, 0, 2))                       # (num_layers, B, latent)
    nkeys = jax.random.split(noise_key, len(params['blocks']))
    feature = None
    for i, blk in enumerate(params['blocks']):
        x, feature = generator_block(blk, x, feature, styles_t[i], nkeys[i],
                                     use_noise=use_noise)
    # return feature in NCDHW like PyTorch
    return jnp.transpose(feature, (0, 4, 1, 2, 3)).astype(jnp.float32)


# ---------------------------------------------------------------------------
# Demo
# ---------------------------------------------------------------------------
if __name__ == "__main__":
    vol_size = 8
    latent_dim = 32
    network_capacity = 2
    fmap_max = 512
    feature_dim = 16
    batch = 2

    key = jax.random.PRNGKey(0)
    kp, ks, kn, knz = jax.random.split(key, 4)

    params = init_params(kp, vol_size, latent_dim, network_capacity, fmap_max, feature_dim)
    num_layers = params['num_layers']

    styles = jax.random.normal(ks, (batch, num_layers, latent_dim), jnp.float32)
    input_noise = jax.random.normal(kn, (batch, vol_size, vol_size, vol_size, 1), jnp.float32)

    feature = generator_forward(params, styles, input_noise, knz, use_noise=True)
    feature = jax.block_until_ready(feature)

    assert feature.shape == (batch, feature_dim, vol_size, vol_size, vol_size), feature.shape
    assert bool(jnp.all(jnp.isfinite(feature)))
    print("KERNEL_OK")
</pallas_src>

<mosaic_0001>
module attributes {stable_mosaic.version = 11 : i64} {
  func.func @_conv3x3_kernel(%arg0: i32, %arg1: i32, %arg2: memref<1x1x6x6x32xbf16, #tpu.memory_space<vmem>>, %arg3: memref<1x1x6x6x32xbf16, #tpu.memory_space<vmem>>, %arg4: memref<1x1x6x6x32xbf16, #tpu.memory_space<vmem>>, %arg5: memref<27x32x32xbf16, #tpu.memory_space<vmem>>, %arg6: memref<1x32xf32, #tpu.memory_space<vmem>>, %arg7: memref<1x1x16x32xbf16, #tpu.memory_space<vmem>>) attributes {dimension_semantics = [#tpu.dimension_semantics<parallel>, #tpu.dimension_semantics<parallel>], iteration_bounds = array<i64: 2, 4>, scalar_prefetch = 0 : i64, scratch_operands = 0 : i64, tpu.core_type = #tpu.core_type<tc>, window_params = [{transform_indices = @transform_0, window_bounds = array<i64: 1, 1, 6, 6, 32>}, {transform_indices = @transform_1, window_bounds = array<i64: 1, 1, 6, 6, 32>}, {transform_indices = @transform_2, window_bounds = array<i64: 1, 1, 6, 6, 32>}, {pipeline_mode = #tpu.pipeline_mode<synchronous>, transform_indices = @transform_3, window_bounds = array<i64: 27, 32, 32>}, {pipeline_mode = #tpu.pipeline_mode<synchronous>, transform_indices = @transform_4, window_bounds = array<i64: 1, 32>}, {transform_indices = @transform_5, window_bounds = array<i64: 1, 1, 16, 32>}]} {
    %c0 = arith.constant 0 : index
    %c0_0 = arith.constant 0 : index
    %c0_1 = arith.constant 0 : index
    %0 = vector.load %arg5[%c0, %c0_0, %c0_1] : memref<27x32x32xbf16, #tpu.memory_space<vmem>>, vector<27x32x32xbf16>
    %cst = arith.constant 0.000000e+00 : f32
    %1 = vector.broadcast %cst : f32 to vector<16x32xf32>
    %c0_2 = arith.constant 0 : index
    %c0_3 = arith.constant 0 : index
    %c0_4 = arith.constant 0 : index
    %c0_5 = arith.constant 0 : index
    %c0_6 = arith.constant 0 : index
    %2 = vector.load %arg2[%c0_2, %c0_3, %c0_4, %c0_5, %c0_6] : memref<1x1x6x6x32xbf16, #tpu.memory_space<vmem>>, vector<1x1x6x6x32xbf16>
    %3 = vector.shape_cast %2 : vector<1x1x6x6x32xbf16> to vector<6x6x32xbf16>
    %4 = vector.extract_strided_slice %3 {offsets = [0, 0, 0], sizes = [4, 4, 32], strides = [1, 1, 1]} : vector<6x6x32xbf16> to vector<4x4x32xbf16>
    %5 = vector.shape_cast %4 : vector<4x4x32xbf16> to vector<16x32xbf16>
    %6 = vector.extract_strided_slice %0 {offsets = [0, 0, 0], sizes = [1, 32, 32], strides = [1, 1, 1]} : vector<27x32x32xbf16> to vector<1x32x32xbf16>
    %7 = vector.shape_cast %6 : vector<1x32x32xbf16> to vector<32x32xbf16>
    %cst_7 = arith.constant dense<0.000000e+00> : vector<16x32xf32>
    %8 = tpu.matmul %5, %7, %cst_7 {dimension_numbers = #tpu.dot_dimension_numbers<[1], [0], [0], [1], [0, 0, 1, 1], [], []>} : vector<16x32xbf16>, vector<32x32xbf16>, vector<16x32xf32> -> vector<16x32xf32>
    %9 = arith.addf %1, %8 : vector<16x32xf32>
    %10 = vector.extract_strided_slice %3 {offsets = [0, 1, 0], sizes = [4, 4, 32], strides = [1, 1, 1]} : vector<6x6x32xbf16> to vector<4x4x32xbf16>
    %11 = vector.shape_cast %10 : vector<4x4x32xbf16> to vector<16x32xbf16>
    %12 = vector.extract_strided_slice %0 {offsets = [1, 0, 0], sizes = [1, 32, 32], strides = [1, 1, 1]} : vector<27x32x32xbf16> to vector<1x32x32xbf16>
    %13 = vector.shape_cast %12 : vector<1x32x32xbf16> to vector<32x32xbf16>
    %cst_8 = arith.constant dense<0.000000e+00> : vector<16x32xf32>
    %14 = tpu.matmul %11, %13, %cst_8 {dimension_numbers = #tpu.dot_dimension_numbers<[1], [0], [0], [1], [0, 0, 1, 1], [], []>} : vector<16x32xbf16>, vector<32x32xbf16>, vector<16x32xf32> -> vector<16x32xf32>
    %15 = arith.addf %9, %14 : vector<16x32xf32>
    %16 = vector.extract_strided_slice %3 {offsets = [0, 2, 0], sizes = [4, 4, 32], strides = [1, 1, 1]} : vector<6x6x32xbf16> to vector<4x4x32xbf16>
    %17 = vector.shape_cast %16 : vector<4x4x32xbf16> to vector<16x32xbf16>
    %18 = vector.extract_strided_slice %0 {offsets = [2, 0, 0], sizes = [1, 32, 32], strides = [1, 1, 1]} : vector<27x32x32xbf16> to vector<1x32x32xbf16>
    %19 = vector.shape_cast %18 : vector<1x32x32xbf16> to vector<32x32xbf16>
    %cst_9 = arith.constant dense<0.000000e+00> : vector<16x32xf32>
    %20 = tpu.matmul %17, %19, %cst_9 {dimension_numbers = #tpu.dot_dimension_numbers<[1], [0], [0], [1], [0, 0, 1, 1], [], []>} : vector<16x32xbf16>, vector<32x32xbf16>, vector<16x32xf32> -> vector<16x32xf32>
    %21 = arith.addf %15, %20 : vector<16x32xf32>
    %22 = vector.extract_strided_slice %3 {offsets = [1, 0, 0], sizes = [4, 4, 32], strides = [1, 1, 1]} : vector<6x6x32xbf16> to vector<4x4x32xbf16>
    %23 = vector.shape_cast %22 : vector<4x4x32xbf16> to vector<16x32xbf16>
    %24 = vector.extract_strided_slice %0 {offsets = [3, 0, 0], sizes = [1, 32, 32], strides = [1, 1, 1]} : vector<27x32x32xbf16> to vector<1x32x32xbf16>
    %25 = vector.shape_cast %24 : vector<1x32x32xbf16> to vector<32x32xbf16>
    %cst_10 = arith.constant dense<0.000000e+00> : vector<16x32xf32>
    %26 = tpu.matmul %23, %25, %cst_10 {dimension_numbers = #tpu.dot_dimension_numbers<[1], [0], [0], [1], [0, 0, 1, 1], [], []>} : vector<16x32xbf16>, vector<32x32xbf16>, vector<16x32xf32> -> vector<16x32xf32>
    %27 = arith.addf %21, %26 : vector<16x32xf32>
    %28 = vector.extract_strided_slice %3 {offsets = [1, 1, 0], sizes = [4, 4, 32], strides = [1, 1, 1]} : vector<6x6x32xbf16> to vector<4x4x32xbf16>
    %29 = vector.shape_cast %28 : vector<4x4x32xbf16> to vector<16x32xbf16>
    %30 = vector.extract_strided_slice %0 {offsets = [4, 0, 0], sizes = [1, 32, 32], strides = [1, 1, 1]} : vector<27x32x32xbf16> to vector<1x32x32xbf16>
    %31 = vector.shape_cast %30 : vector<1x32x32xbf16> to vector<32x32xbf16>
    %cst_11 = arith.constant dense<0.000000e+00> : vector<16x32xf32>
    %32 = tpu.matmul %29, %31, %cst_11 {dimension_numbers = #tpu.dot_dimension_numbers<[1], [0], [0], [1], [0, 0, 1, 1], [], []>} : vector<16x32xbf16>, vector<32x32xbf16>, vector<16x32xf32> -> vector<16x32xf32>
    %33 = arith.addf %27, %32 : vector<16x32xf32>
    %34 = vector.extract_strided_slice %3 {offsets = [1, 2, 0], sizes = [4, 4, 32], strides = [1, 1, 1]} : vector<6x6x32xbf16> to vector<4x4x32xbf16>
    %35 = vector.shape_cast %34 : vector<4x4x32xbf16> to vector<16x32xbf16>
    %36 = vector.extract_strided_slice %0 {offsets = [5, 0, 0], sizes = [1, 32, 32], strides = [1, 1, 1]} : vector<27x32x32xbf16> to vector<1x32x32xbf16>
    %37 = vector.shape_cast %36 : vector<1x32x32xbf16> to vector<32x32xbf16>
    %cst_12 = arith.constant dense<0.000000e+00> : vector<16x32xf32>
    %38 = tpu.matmul %35, %37, %cst_12 {dimension_numbers = #tpu.dot_dimension_numbers<[1], [0], [0], [1], [0, 0, 1, 1], [], []>} : vector<16x32xbf16>, vector<32x32xbf16>, vector<16x32xf32> -> vector<16x32xf32>
    %39 = arith.addf %33, %38 : vector<16x32xf32>
    %40 = vector.extract_strided_slice %3 {offsets = [2, 0, 0], sizes = [4, 4, 32], strides = [1, 1, 1]} : vector<6x6x32xbf16> to vector<4x4x32xbf16>
    %41 = vector.shape_cast %40 : vector<4x4x32xbf16> to vector<16x32xbf16>
    %42 = vector.extract_strided_slice %0 {offsets = [6, 0, 0], sizes = [1, 32, 32], strides = [1, 1, 1]} : vector<27x32x32xbf16> to vector<1x32x32xbf16>
    %43 = vector.shape_cast %42 : vector<1x32x32xbf16> to vector<32x32xbf16>
    %cst_13 = arith.constant dense<0.000000e+00> : vector<16x32xf32>
    %44 = tpu.matmul %41, %43, %cst_13 {dimension_numbers = #tpu.dot_dimension_numbers<[1], [0], [0], [1], [0, 0, 1, 1], [], []>} : vector<16x32xbf16>, vector<32x32xbf16>, vector<16x32xf32> -> vector<16x32xf32>
    %45 = arith.addf %39, %44 : vector<16x32xf32>
    %46 = vector.extract_strided_slice %3 {offsets = [2, 1, 0], sizes = [4, 4, 32], strides = [1, 1, 1]} : vector<6x6x32xbf16> to vector<4x4x32xbf16>
    %47 = vector.shape_cast %46 : vector<4x4x32xbf16> to vector<16x32xbf16>
    %48 = vector.extract_strided_slice %0 {offsets = [7, 0, 0], sizes = [1, 32, 32], strides = [1, 1, 1]} : vector<27x32x32xbf16> to vector<1x32x32xbf16>
    %49 = vector.shape_cast %48 : vector<1x32x32xbf16> to vector<32x32xbf16>
    %cst_14 = arith.constant dense<0.000000e+00> : vector<16x32xf32>
    %50 = tpu.matmul %47, %49, %cst_14 {dimension_numbers = #tpu.dot_dimension_numbers<[1], [0], [0], [1], [0, 0, 1, 1], [], []>} : vector<16x32xbf16>, vector<32x32xbf16>, vector<16x32xf32> -> vector<16x32xf32>
    %51 = arith.addf %45, %50 : vector<16x32xf32>
    %52 = vector.extract_strided_slice %3 {offsets = [2, 2, 0], sizes = [4, 4, 32], strides = [1, 1, 1]} : vector<6x6x32xbf16> to vector<4x4x32xbf16>
    %53 = vector.shape_cast %52 : vector<4x4x32xbf16> to vector<16x32xbf16>
    %54 = vector.extract_strided_slice %0 {offsets = [8, 0, 0], sizes = [1, 32, 32], strides = [1, 1, 1]} : vector<27x32x32xbf16> to vector<1x32x32xbf16>
    %55 = vector.shape_cast %54 : vector<1x32x32xbf16> to vector<32x32xbf16>
    %cst_15 = arith.constant dense<0.000000e+00> : vector<16x32xf32>
    %56 = tpu.matmul %53, %55, %cst_15 {dimension_numbers = #tpu.dot_dimension_numbers<[1], [0], [0], [1], [0, 0, 1, 1], [], []>} : vector<16x32xbf16>, vector<32x32xbf16>, vector<16x32xf32> -> vector<16x32xf32>
    %57 = arith.addf %51, %56 : vector<16x32xf32>
    %c0_16 = arith.constant 0 : index
    %c0_17 = arith.constant 0 : index
    %c0_18 = arith.constant 0 : index
    %c0_19 = arith.constant 0 : index
    %c0_20 = arith.constant 0 : index
    %58 = vector.load %arg3[%c0_16, %c0_17, %c0_18, %c0_19, %c0_20] : memref<1x1x6x6x32xbf16, #tpu.memory_space<vmem>>, vector<1x1x6x6x32xbf16>
    %59 = vector.shape_cast %58 : vector<1x1x6x6x32xbf16> to vector<6x6x32xbf16>
    %60 = vector.extract_strided_slice %59 {offsets = [0, 0, 0], sizes = [4, 4, 32], strides = [1, 1, 1]} : vector<6x6x32xbf16> to vector<4x4x32xbf16>
    %61 = vector.shape_cast %60 : vector<4x4x32xbf16> to vector<16x32xbf16>
    %62 = vector.extract_strided_slice %0 {offsets = [9, 0, 0], sizes = [1, 32, 32], strides = [1, 1, 1]} : vector<27x32x32xbf16> to vector<1x32x32xbf16>
    %63 = vector.shape_cast %62 : vector<1x32x32xbf16> to vector<32x32xbf16>
    %cst_21 = arith.constant dense<0.000000e+00> : vector<16x32xf32>
    %64 = tpu.matmul %61, %63, %cst_21 {dimension_numbers = #tpu.dot_dimension_numbers<[1], [0], [0], [1], [0, 0, 1, 1], [], []>} : vector<16x32xbf16>, vector<32x32xbf16>, vector<16x32xf32> -> vector<16x32xf32>
    %65 = arith.addf %57, %64 : vector<16x32xf32>
    %66 = vector.extract_strided_slice %59 {offsets = [0, 1, 0], sizes = [4, 4, 32], strides = [1, 1, 1]} : vector<6x6x32xbf16> to vector<4x4x32xbf16>
    %67 = vector.shape_cast %66 : vector<4x4x32xbf16> to vector<16x32xbf16>
    %68 = vector.extract_strided_slice %0 {offsets = [10, 0, 0], sizes = [1, 32, 32], strides = [1, 1, 1]} : vector<27x32x32xbf16> to vector<1x32x32xbf16>
    %69 = vector.shape_cast %68 : vector<1x32x32xbf16> to vector<32x32xbf16>
    %cst_22 = arith.constant dense<0.000000e+00> : vector<16x32xf32>
    %70 = tpu.matmul %67, %69, %cst_22 {dimension_numbers = #tpu.dot_dimension_numbers<[1], [0], [0], [1], [0, 0, 1, 1], [], []>} : vector<16x32xbf16>, vector<32x32xbf16>, vector<16x32xf32> -> vector<16x32xf32>
    %71 = arith.addf %65, %70 : vector<16x32xf32>
    %72 = vector.extract_strided_slice %59 {offsets = [0, 2, 0], sizes = [4, 4, 32], strides = [1, 1, 1]} : vector<6x6x32xbf16> to vector<4x4x32xbf16>
    %73 = vector.shape_cast %72 : vector<4x4x32xbf16> to vector<16x32xbf16>
    %74 = vector.extract_strided_slice %0 {offsets = [11, 0, 0], sizes = [1, 32, 32], strides = [1, 1, 1]} : vector<27x32x32xbf16> to vector<1x32x32xbf16>
    %75 = vector.shape_cast %74 : vector<1x32x32xbf16> to vector<32x32xbf16>
    %cst_23 = arith.constant dense<0.000000e+00> : vector<16x32xf32>
    %76 = tpu.matmul %73, %75, %cst_23 {dimension_numbers = #tpu.dot_dimension_numbers<[1], [0], [0], [1], [0, 0, 1, 1], [], []>} : vector<16x32xbf16>, vector<32x32xbf16>, vector<16x32xf32> -> vector<16x32xf32>
    %77 = arith.addf %71, %76 : vector<16x32xf32>
    %78 = vector.extract_strided_slice %59 {offsets = [1, 0, 0], sizes = [4, 4, 32], strides = [1, 1, 1]} : vector<6x6x32xbf16> to vector<4x4x32xbf16>
    %79 = vector.shape_cast %78 : vector<4x4x32xbf16> to vector<16x32xbf16>
    %80 = vector.extract_strided_slice %0 {offsets = [12, 0, 0], sizes = [1, 32, 32], strides = [1, 1, 1]} : vector<27x32x32xbf16> to vector<1x32x32xbf16>
    %81 = vector.shape_cast %80 : vector<1x32x32xbf16> to vector<32x32xbf16>
    %cst_24 = arith.constant dense<0.000000e+00> : vector<16x32xf32>
    %82 = tpu.matmul %79, %81, %cst_24 {dimension_numbers = #tpu.dot_dimension_numbers<[1], [0], [0], [1], [0, 0, 1, 1], [], []>} : vector<16x32xbf16>, vector<32x32xbf16>, vector<16x32xf32> -> vector<16x32xf32>
    %83 = arith.addf %77, %82 : vector<16x32xf32>
    %84 = vector.extract_strided_slice %59 {offsets = [1, 1, 0], sizes = [4, 4, 32], strides = [1, 1, 1]} : vector<6x6x32xbf16> to vector<4x4x32xbf16>
    %85 = vector.shape_cast %84 : vector<4x4x32xbf16> to vector<16x32xbf16>
    %86 = vector.extract_strided_slice %0 {offsets = [13, 0, 0], sizes = [1, 32, 32], strides = [1, 1, 1]} : vector<27x32x32xbf16> to vector<1x32x32xbf16>
    %87 = vector.shape_cast %86 : vector<1x32x32xbf16> to vector<32x32xbf16>
    %cst_25 = arith.constant dense<0.000000e+00> : vector<16x32xf32>
    %88 = tpu.matmul %85, %87, %cst_25 {dimension_numbers = #tpu.dot_dimension_numbers<[1], [0], [0], [1], [0, 0, 1, 1], [], []>} : vector<16x32xbf16>, vector<32x32xbf16>, vector<16x32xf32> -> vector<16x32xf32>
    %89 = arith.addf %83, %88 : vector<16x32xf32>
    %90 = vector.extract_strided_slice %59 {offsets = [1, 2, 0], sizes = [4, 4, 32], strides = [1, 1, 1]} : vector<6x6x32xbf16> to vector<4x4x32xbf16>
    %91 = vector.shape_cast %90 : vector<4x4x32xbf16> to vector<16x32xbf16>
    %92 = vector.extract_strided_slice %0 {offsets = [14, 0, 0], sizes = [1, 32, 32], strides = [1, 1, 1]} : vector<27x32x32xbf16> to vector<1x32x32xbf16>
    %93 = vector.shape_cast %92 : vector<1x32x32xbf16> to vector<32x32xbf16>
    %cst_26 = arith.constant dense<0.000000e+00> : vector<16x32xf32>
    %94 = tpu.matmul %91, %93, %cst_26 {dimension_numbers = #tpu.dot_dimension_numbers<[1], [0], [0], [1], [0, 0, 1, 1], [], []>} : vector<16x32xbf16>, vector<32x32xbf16>, vector<16x32xf32> -> vector<16x32xf32>
    %95 = arith.addf %89, %94 : vector<16x32xf32>
    %96 = vector.extract_strided_slice %59 {offsets = [2, 0, 0], sizes = [4, 4, 32], strides = [1, 1, 1]} : vector<6x6x32xbf16> to vector<4x4x32xbf16>
    %97 = vector.shape_cast %96 : vector<4x4x32xbf16> to vector<16x32xbf16>
    %98 = vector.extract_strided_slice %0 {offsets = [15, 0, 0], sizes = [1, 32, 32], strides = [1, 1, 1]} : vector<27x32x32xbf16> to vector<1x32x32xbf16>
    %99 = vector.shape_cast %98 : vector<1x32x32xbf16> to vector<32x32xbf16>
    %cst_27 = arith.constant dense<0.000000e+00> : vector<16x32xf32>
    %100 = tpu.matmul %97, %99, %cst_27 {dimension_numbers = #tpu.dot_dimension_numbers<[1], [0], [0], [1], [0, 0, 1, 1], [], []>} : vector<16x32xbf16>, vector<32x32xbf16>, vector<16x32xf32> -> vector<16x32xf32>
    %101 = arith.addf %95, %100 : vector<16x32xf32>
    %102 = vector.extract_strided_slice %59 {offsets = [2, 1, 0], sizes = [4, 4, 32], strides = [1, 1, 1]} : vector<6x6x32xbf16> to vector<4x4x32xbf16>
    %103 = vector.shape_cast %102 : vector<4x4x32xbf16> to vector<16x32xbf16>
    %104 = vector.extract_strided_slice %0 {offsets = [16, 0, 0], sizes = [1, 32, 32], strides = [1, 1, 1]} : vector<27x32x32xbf16> to vector<1x32x32xbf16>
    %105 = vector.shape_cast %104 : vector<1x32x32xbf16> to vector<32x32xbf16>
    %cst_28 = arith.constant dense<0.000000e+00> : vector<16x32xf32>
    %106 = tpu.matmul %103, %105, %cst_28 {dimension_numbers = #tpu.dot_dimension_numbers<[1], [0], [0], [1], [0, 0, 1, 1], [], []>} : vector<16x32xbf16>, vector<32x32xbf16>, vector<16x32xf32> -> vector<16x32xf32>
    %107 = arith.addf %101, %106 : vector<16x32xf32>
    %108 = vector.extract_strided_slice %59 {offsets = [2, 2, 0], sizes = [4, 4, 32], strides = [1, 1, 1]} : vector<6x6x32xbf16> to vector<4x4x32xbf16>
    %109 = vector.shape_cast %108 : vector<4x4x32xbf16> to vector<16x32xbf16>
    %110 = vector.extract_strided_slice %0 {offsets = [17, 0, 0], sizes = [1, 32, 32], strides = [1, 1, 1]} : vector<27x32x32xbf16> to vector<1x32x32xbf16>
    %111 = vector.shape_cast %110 : vector<1x32x32xbf16> to vector<32x32xbf16>
    %cst_29 = arith.constant dense<0.000000e+00> : vector<16x32xf32>
    %112 = tpu.matmul %109, %111, %cst_29 {dimension_numbers = #tpu.dot_dimension_numbers<[1], [0], [0], [1], [0, 0, 1, 1], [], []>} : vector<16x32xbf16>, vector<32x32xbf16>, vector<16x32xf32> -> vector<16x32xf32>
    %113 = arith.addf %107, %112 : vector<16x32xf32>
    %c0_30 = arith.constant 0 : index
    %c0_31 = arith.constant 0 : index
    %c0_32 = arith.constant 0 : index
    %c0_33 = arith.constant 0 : index
    %c0_34 = arith.constant 0 : index
    %114 = vector.load %arg4[%c0_30, %c0_31, %c0_32, %c0_33, %c0_34] : memref<1x1x6x6x32xbf16, #tpu.memory_space<vmem>>, vector<1x1x6x6x32xbf16>
    %115 = vector.shape_cast %114 : vector<1x1x6x6x32xbf16> to vector<6x6x32xbf16>
    %116 = vector.extract_strided_slice %115 {offsets = [0, 0, 0], sizes = [4, 4, 32], strides = [1, 1, 1]} : vector<6x6x32xbf16> to vector<4x4x32xbf16>
    %117 = vector.shape_cast %116 : vector<4x4x32xbf16> to vector<16x32xbf16>
    %118 = vector.extract_strided_slice %0 {offsets = [18, 0, 0], sizes = [1, 32, 32], strides = [1, 1, 1]} : vector<27x32x32xbf16> to vector<1x32x32xbf16>
    %119 = vector.shape_cast %118 : vector<1x32x32xbf16> to vector<32x32xbf16>
    %cst_35 = arith.constant dense<0.000000e+00> : vector<16x32xf32>
    %120 = tpu.matmul %117, %119, %cst_35 {dimension_numbers = #tpu.dot_dimension_numbers<[1], [0], [0], [1], [0, 0, 1, 1], [], []>} : vector<16x32xbf16>, vector<32x32xbf16>, vector<16x32xf32> -> vector<16x32xf32>
    %121 = arith.addf %113, %120 : vector<16x32xf32>
    %122 = vector.extract_strided_slice %115 {offsets = [0, 1, 0], sizes = [4, 4, 32], strides = [1, 1, 1]} : vector<6x6x32xbf16> to vector<4x4x32xbf16>
    %123 = vector.shape_cast %122 : vector<4x4x32xbf16> to vector<16x32xbf16>
    %124 = vector.extract_strided_slice %0 {offsets = [19, 0, 0], sizes = [1, 32, 32], strides = [1, 1, 1]} : vector<27x32x32xbf16> to vector<1x32x32xbf16>
    %125 = vector.shape_cast %124 : vector<1x32x32xbf16> to vector<32x32xbf16>
    %cst_36 = arith.constant dense<0.000000e+00> : vector<16x32xf32>
    %126 = tpu.matmul %123, %125, %cst_36 {dimension_numbers = #tpu.dot_dimension_numbers<[1], [0], [0], [1], [0, 0, 1, 1], [], []>} : vector<16x32xbf16>, vector<32x32xbf16>, vector<16x32xf32> -> vector<16x32xf32>
    %127 = arith.addf %121, %126 : vector<16x32xf32>
    %128 = vector.extract_strided_slice %115 {offsets = [0, 2, 0], sizes = [4, 4, 32], strides = [1, 1, 1]} : vector<6x6x32xbf16> to vector<4x4x32xbf16>
    %129 = vector.shape_cast %128 : vector<4x4x32xbf16> to vector<16x32xbf16>
    %130 = vector.extract_strided_slice %0 {offsets = [20, 0, 0], sizes = [1, 32, 32], strides = [1, 1, 1]} : vector<27x32x32xbf16> to vector<1x32x32xbf16>
    %131 = vector.shape_cast %130 : vector<1x32x32xbf16> to vector<32x32xbf16>
    %cst_37 = arith.constant dense<0.000000e+00> : vector<16x32xf32>
    %132 = tpu.matmul %129, %131, %cst_37 {dimension_numbers = #tpu.dot_dimension_numbers<[1], [0], [0], [1], [0, 0, 1, 1], [], []>} : vector<16x32xbf16>, vector<32x32xbf16>, vector<16x32xf32> -> vector<16x32xf32>
    %133 = arith.addf %127, %132 : vector<16x32xf32>
    %134 = vector.extract_strided_slice %115 {offsets = [1, 0, 0], sizes = [4, 4, 32], strides = [1, 1, 1]} : vector<6x6x32xbf16> to vector<4x4x32xbf16>
    %135 = vector.shape_cast %134 : vector<4x4x32xbf16> to vector<16x32xbf16>
    %136 = vector.extract_strided_slice %0 {offsets = [21, 0, 0], sizes = [1, 32, 32], strides = [1, 1, 1]} : vector<27x32x32xbf16> to vector<1x32x32xbf16>
    %137 = vector.shape_cast %136 : vector<1x32x32xbf16> to vector<32x32xbf16>
    %cst_38 = arith.constant dense<0.000000e+00> : vector<16x32xf32>
    %138 = tpu.matmul %135, %137, %cst_38 {dimension_numbers = #tpu.dot_dimension_numbers<[1], [0], [0], [1], [0, 0, 1, 1], [], []>} : vector<16x32xbf16>, vector<32x32xbf16>, vector<16x32xf32> -> vector<16x32xf32>
    %139 = arith.addf %133, %138 : vector<16x32xf32>
    %140 = vector.extract_strided_slice %115 {offsets = [1, 1, 0], sizes = [4, 4, 32], strides = [1, 1, 1]} : vector<6x6x32xbf16> to vector<4x4x32xbf16>
    %141 = vector.shape_cast %140 : vector<4x4x32xbf16> to vector<16x32xbf16>
    %142 = vector.extract_strided_slice %0 {offsets = [22, 0, 0], sizes = [1, 32, 32], strides = [1, 1, 1]} : vector<27x32x32xbf16> to vector<1x32x32xbf16>
    %143 = vector.shape_cast %142 : vector<1x32x32xbf16> to vector<32x32xbf16>
    %cst_39 = arith.constant dense<0.000000e+00> : vector<16x32xf32>
    %144 = tpu.matmul %141, %143, %cst_39 {dimension_numbers = #tpu.dot_dimension_numbers<[1], [0], [0], [1], [0, 0, 1, 1], [], []>} : vector<16x32xbf16>, vector<32x32xbf16>, vector<16x32xf32> -> vector<16x32xf32>
    %145 = arith.addf %139, %144 : vector<16x32xf32>
    %146 = vector.extract_strided_slice %115 {offsets = [1, 2, 0], sizes = [4, 4, 32], strides = [1, 1, 1]} : vector<6x6x32xbf16> to vector<4x4x32xbf16>
    %147 = vector.shape_cast %146 : vector<4x4x32xbf16> to vector<16x32xbf16>
    %148 = vector.extract_strided_slice %0 {offsets = [23, 0, 0], sizes = [1, 32, 32], strides = [1, 1, 1]} : vector<27x32x32xbf16> to vector<1x32x32xbf16>
    %149 = vector.shape_cast %148 : vector<1x32x32xbf16> to vector<32x32xbf16>
    %cst_40 = arith.constant dense<0.000000e+00> : vector<16x32xf32>
    %150 = tpu.matmul %147, %149, %cst_40 {dimension_numbers = #tpu.dot_dimension_numbers<[1], [0], [0], [1], [0, 0, 1, 1], [], []>} : vector<16x32xbf16>, vector<32x32xbf16>, vector<16x32xf32> -> vector<16x32xf32>
    %151 = arith.addf %145, %150 : vector<16x32xf32>
    %152 = vector.extract_strided_slice %115 {offsets = [2, 0, 0], sizes = [4, 4, 32], strides = [1, 1, 1]} : vector<6x6x32xbf16> to vector<4x4x32xbf16>
    %153 = vector.shape_cast %152 : vector<4x4x32xbf16> to vector<16x32xbf16>
    %154 = vector.extract_strided_slice %0 {offsets = [24, 0, 0], sizes = [1, 32, 32], strides = [1, 1, 1]} : vector<27x32x32xbf16> to vector<1x32x32xbf16>
    %155 = vector.shape_cast %154 : vector<1x32x32xbf16> to vector<32x32xbf16>
    %cst_41 = arith.constant dense<0.000000e+00> : vector<16x32xf32>
    %156 = tpu.matmul %153, %155, %cst_41 {dimension_numbers = #tpu.dot_dimension_numbers<[1], [0], [0], [1], [0, 0, 1, 1], [], []>} : vector<16x32xbf16>, vector<32x32xbf16>, vector<16x32xf32> -> vector<16x32xf32>
    %157 = arith.addf %151, %156 : vector<16x32xf32>
    %158 = vector.extract_strided_slice %115 {offsets = [2, 1, 0], sizes = [4, 4, 32], strides = [1, 1, 1]} : vector<6x6x32xbf16> to vector<4x4x32xbf16>
    %159 = vector.shape_cast %158 : vector<4x4x32xbf16> to vector<16x32xbf16>
    %160 = vector.extract_strided_slice %0 {offsets = [25, 0, 0], sizes = [1, 32, 32], strides = [1, 1, 1]} : vector<27x32x32xbf16> to vector<1x32x32xbf16>
    %161 = vector.shape_cast %160 : vector<1x32x32xbf16> to vector<32x32xbf16>
    %cst_42 = arith.constant dense<0.000000e+00> : vector<16x32xf32>
    %162 = tpu.matmul %159, %161, %cst_42 {dimension_numbers = #tpu.dot_dimension_numbers<[1], [0], [0], [1], [0, 0, 1, 1], [], []>} : vector<16x32xbf16>, vector<32x32xbf16>, vector<16x32xf32> -> vector<16x32xf32>
    %163 = arith.addf %157, %162 : vector<16x32xf32>
    %164 = vector.extract_strided_slice %115 {offsets = [2, 2, 0], sizes = [4, 4, 32], strides = [1, 1, 1]} : vector<6x6x32xbf16> to vector<4x4x32xbf16>
    %165 = vector.shape_cast %164 : vector<4x4x32xbf16> to vector<16x32xbf16>
    %166 = vector.extract_strided_slice %0 {offsets = [26, 0, 0], sizes = [1, 32, 32], strides = [1, 1, 1]} : vector<27x32x32xbf16> to vector<1x32x32xbf16>
    %167 = vector.shape_cast %166 : vector<1x32x32xbf16> to vector<32x32xbf16>
    %cst_43 = arith.constant dense<0.000000e+00> : vector<16x32xf32>
    %168 = tpu.matmul %165, %167, %cst_43 {dimension_numbers = #tpu.dot_dimension_numbers<[1], [0], [0], [1], [0, 0, 1, 1], [], []>} : vector<16x32xbf16>, vector<32x32xbf16>, vector<16x32xf32> -> vector<16x32xf32>
    %169 = arith.addf %163, %168 : vector<16x32xf32>
    %c0_44 = arith.constant 0 : index
    %c0_45 = arith.constant 0 : index
    %170 = vector.load %arg6[%c0_44, %c0_45] : memref<1x32xf32, #tpu.memory_space<vmem>>, vector<1x32xf32>
    %171 = vector.broadcast %170 : vector<1x32xf32> to vector<16x32xf32>
    %172 = arith.addf %169, %171 : vector<16x32xf32>
    %173 = arith.truncf %172 : vector<16x32xf32> to vector<16x32xbf16>
    %c0_46 = arith.constant 0 : index
    %c0_47 = arith.constant 0 : index
    %c0_48 = arith.constant 0 : index
    %c0_49 = arith.constant 0 : index
    %174 = vector.load %arg7[%c0_46, %c0_47, %c0_48, %c0_49] : memref<1x1x16x32xbf16, #tpu.memory_space<vmem>>, vector<1x1x16x32xbf16>
    %175 = vector.shape_cast %174 : vector<1x1x16x32xbf16> to vector<16x32xbf16>
    %176 = vector.shape_cast %173 : vector<16x32xbf16> to vector<1x1x16x32xbf16>
    tpu.vector_store %arg7[%c0_46, %c0_47, %c0_48, %c0_49], %176 {strides = array<i32>} : memref<1x1x16x32xbf16, #tpu.memory_space<vmem>>, vector<1x1x16x32xbf16>,
    return
  }
  func.func @transform_0(%arg0: i32, %arg1: i32) -> (i32, i32, i32, i32, i32) {
    %c0_i32 = arith.constant 0 : i32
    %c0_i32_0 = arith.constant 0 : i32
    %c0_i32_1 = arith.constant 0 : i32
    %c0_i32_2 = arith.constant 0 : i32
    return %arg0, %arg1, %c0_i32, %c0_i32_0, %c0_i32_1 : i32, i32, i32, i32, i32
  }
  func.func @transform_1(%arg0: i32, %arg1: i32) -> (i32, i32, i32, i32, i32) {
    %c1_i32 = arith.constant 1 : i32
    %0 = arith.addi %arg1, %c1_i32 : i32
    %c0_i32 = arith.constant 0 : i32
    %c0_i32_0 = arith.constant 0 : i32
    %c0_i32_1 = arith.constant 0 : i32
    %c0_i32_2 = arith.constant 0 : i32
    return %arg0, %0, %c0_i32, %c0_i32_0, %c0_i32_1 : i32, i32, i32, i32, i32
  }
  func.func @transform_2(%arg0: i32, %arg1: i32) -> (i32, i32, i32, i32, i32) {
    %c2_i32 = arith.constant 2 : i32
    %0 = arith.addi %arg1, %c2_i32 : i32
    %c0_i32 = arith.constant 0 : i32
    %c0_i32_0 = arith.constant 0 : i32
    %c0_i32_1 = arith.constant 0 : i32
    %c0_i32_2 = arith.constant 0 : i32
    return %arg0, %0, %c0_i32, %c0_i32_0, %c0_i32_1 : i32, i32, i32, i32, i32
  }
  func.func @transform_3(%arg0: i32, %arg1: i32) -> (i32, i32, i32) {
    %c0_i32 = arith.constant 0 : i32
    %c0_i32_0 = arith.constant 0 : i32
    %c0_i32_1 = arith.constant 0 : i32
    %c0_i32_2 = arith.constant 0 : i32
    return %c0_i32, %c0_i32_0, %c0_i32_1 : i32, i32, i32
  }
  func.func @transform_4(%arg0: i32, %arg1: i32) -> (i32, i32) {
    %c0_i32 = arith.constant 0 : i32
    %c0_i32_0 = arith.constant 0 : i32
    %c0_i32_1 = arith.constant 0 : i32
    return %c0_i32, %c0_i32_0 : i32, i32
  }
  func.func @transform_5(%arg0: i32, %arg1: i32) -> (i32, i32, i32, i32) {
    %c0_i32 = arith.constant 0 : i32
    %c0_i32_0 = arith.constant 0 : i32
    %c0_i32_1 = arith.constant 0 : i32
    return %arg0, %arg1, %c0_i32, %c0_i32_0 : i32, i32, i32, i32
  }
}

</mosaic_0001>

<bundles_post_ra>
// kernel: tpu_custom_call.1
= control target key start
LH: loop header
LB: loop body
LE: loop exit
PB: predicated region body
PF: predicated region fallthrough
CT: control target
= control target key end

     0   :  { %10 = vsyncpa [#allocation3], 0  ;;  %s4849_s0 = inlined_call_operand.vmem [shape: bf16[2,6,6,6,32], index: 0, kind: input, shape index: {}]   ;;  %s4850_s1 = inlined_call_operand.vmem [shape: bf16[2,6,6,6,32], index: 1, kind: input, shape index: {}]   ;;  %s4851_s2 = inlined_call_operand.vmem [shape: bf16[2,6,6,6,32], index: 2, kind: input, shape index: {}]   ;;  %s4852_s3 = inlined_call_operand.vmem [shape: bf16[27,32,32], index: 3, kind: input, shape index: {}]   ;;  %s4853_s4 = inlined_call_operand.vmem [shape: f32[1,32], index: 4, kind: input, shape index: {}]   ;;  %s4854_s5 = inlined_call_operand.hbm [shape: bf16[2,4,16,32], index: 5, kind: output, shape index: {}]  }
   0x1   :  { %12 = vsyncpa [#allocation3 + $0x1], 0  ;;  %s3770_s18 = smov 0   ;;  %s3772_s19 = smov 0  }
   0x2   :  { %s3774_s20 = smov 0   ;;  %s3776_s21 = smov 0  }
   0x3   :  { %s3778_s22 = smov 0   ;;  %s3780_s23 = smov 0  }
   0x4   :  { %s3782_s24 = smov 0   ;;  %s3784_s25 = smov 0  }
   0x5 LB: > { %s3073_s26 = sadd.s32 4294967295, %s3732_s25   ;;  %s3074_s27 = sadd.s32 4294967294, %s3732_s25   ;;  %s3732_s25 = sphi %s3784_s25, %s18_s25   ;;  %s3728_s24 = sphi %s3782_s24, %s4869_s24   ;;  %s3724_s23 = sphi %s3780_s23, %s4868_s23   ;;  %s3720_s22 = sphi %s3778_s22, %s4867_s22   ;;  %s3716_s21 = sphi %s3776_s21, %s4866_s21   ;;  %s3712_s20 = sphi %s3774_s20, %s4865_s20   ;;  %s3708_s19 = sphi %s3772_s19, %s4864_s19   ;;  %s3704_s18 = sphi %s3770_s18, %s4863_s18  }
   0x6   : > { %s27_s28 = sadd.s32 1, %s3724_s23  ;;  %s30_s29 = sadd.s32 1, %s3728_s24 }
   0x7   : > { %p28_p0 = scmp.ge.s32.totalorder %s27_s28, 4  ;;  %p179_p1 = scmp.ne.s32.totalorder %s3712_s20, %s3708_s19 }
   0x8   : > { %p180_p2 = scmp.eq.s32.totalorder %s3073_s26, 7  ;;  %p185_p5 = scmp.ne.s32.totalorder %s3708_s19, %s3704_s18 }
   0x9   : > { %s4871_s28 = smov (%p28_p0, %s27_s28), 0  ;;  %s4873_s29 = smov (!%p28_p0, %s30_s29), %s3728_s24 }
   0xa   : > { %s165_s30 = ssub.s32 %s3724_s23, %s4871_s28  ;;  %p3821_p3 = por %p180_p2, %p179_p1 }
   0xb   : > { %p32_p4 = scmp.ge.s32.totalorder %s4873_s29, 2  ;;  %p186_p6 = scmp.eq.s32.totalorder %s3074_s27, 7 }
   0xc   : > { %p3077_p7 = scmp.ge.s32.totalorder %s3732_s25, 1  ;;  %p250_p9 = scmp.lt.s32.totalorder %s3732_s25, 9 }
   0xd   : > { %s4875_s29 = smov (%p32_p4, %s4873_s29), 0  ;;  %p3830_p8 = por %p186_p6, %p185_p5 }
   0xe   : > { %s164_s8 = ssub.s32 %s3728_s24, %s4875_s29  ;;  %s169_s9 = sadd.s32 1, %s3712_s20 }
   0xf   : > { %s166_s10 = sor.u32 %s165_s30, %s164_s8  ;;  %p251_p10 = pnand %p3077_p7, %p250_p9 }
  0x10   : > { %p167_p11 = scmp.eq.s32.totalorder %s166_s10, 0  ;;  %v3569_v0 = vld [vmem:[%s4852_s3 + $0x10] sm:$0xff] (!%p251_p10)   ;;  %v3734_v1 = vmov (!%p251_p10), 0.0   ;;  %v3570_v2 = vld [vmem:[%s4852_s3] sm:$0xff] (!%p251_p10)   ;;  %v455_v3 = vlaneseq (!%p251_p10)  ;;  %v3571_v4 = vld [vmem:[%s4852_s3 + $0x18] sm:$0xff] (!%p251_p10)   ;;  %vm3735_vm0 = vmmov (!%p251_p10), 0  }
  0x11   : > { %254 = sbr.rel (%p251_p10) target bundleno = 395 (0x18b), region = 40  ;;  %3273 = vmatprep.subr.bf16.mxu0 (!%p251_p10), %v3734_v1  ;;  %3281 = vmatprep.subr.bf16.mxu1 (!%p251_p10), %v3734_v1  ;;  %p302_p12 = scmp.lt.s32.totalorder (!%p251_p10), %s3720_s22, 1  ;;  %v3572_v5 = vld [vmem:[%s4852_s3 + $0x8] sm:$0xff] (!%p251_p10)   ;;  %v3736_v6 = vmov (!%p251_p10), 1983009808   ;;  %vm694_vm5 = vcmask (!%p251_p10), 1040384  }
  0x12   : > { %s3839_s11 = scalar_select %p167_p11, %s3712_s20, %s169_s9  }
  0x13   : > { %3274 = vmatpush3.bf16.msra.mxu0 (!%p251_p10), %v3569_v0  ;;  %3277 = vmatprep.mubr.msk.bf16.mxu0 (!%p251_p10), %vm3735_vm0, %v3734_v1  ;;  %p304_p13 = scmp.lt.s32.totalorder (!%p251_p10), %s3716_s21, 5  ;;  %v453_v7 = vunpack.c.l.s4 (!%p251_p10), %v3736_v6  ;;  %v456_v8 = vshrl.u32 (!%p251_p10), %v455_v3, 7  ;;  %vm484_vm1 = vsmask.f32 (!%p251_p10), 1280  ;;  %vm485_vm2 = vsmask.f32 (!%p251_p10), 3336 }
  0x14   : > { %3282 = vmatpush3.bf16.msra.mxu1 (!%p251_p10), %v3570_v2  ;;  %3275 = vmatprep.subr.bf16.mxu0 (!%p251_p10), %v3734_v1  ;;  %vm487_vm3 = vsmask.f32 (!%p251_p10), 5392  ;;  %vm489_vm4 = vsmask.f32 (!%p251_p10), 7448  ;;  %vm695_vm6 = vcmask (!%p251_p10), 1042434   ;;  %vm486_vm7 = vmor (!%p251_p10), %vm484_vm1, %vm485_vm2  ;;  %vm697_vm8 = vcmask (!%p251_p10), 1044484  }
  0x15   : > { %3283 = vmatprep.subr.bf16.mxu1 (!%p251_p10), %v3734_v1  ;;  %3285 = vmatprep.mubr.msk.bf16.mxu1 (!%p251_p10), %vm3735_vm0, %v3734_v1  ;;  %v454_v9 = vunpack.c.0.s8 (!%p251_p10), %v453_v7  ;;  %s311_s17 = sadd.s32 (!%p251_p10), 1, %s3716_s21  ;;  %vm488_vm9 = vmor (!%p251_p10), %vm486_vm7, %vm487_vm3  ;;  %vm576_vm11 = vcmask (!%p251_p10), 261120   ;;  %vm699_vm13 = vcmask (!%p251_p10), 1046534   ;;  %s322_s15 = sadd.s32 (!%p251_p10), 2, %s3716_s21 }
  0x16   : > { %vm3944_vm10 = vmor (!%p251_p10), %vm488_vm9, %vm489_vm4  ;;  %p3956_p0 = scmp.lt.s32.totalorder (!%p251_p10), %s311_s17, 5  ;;  %p4175_p1 = scmp.lt.s32.totalorder (!%p251_p10), %s322_s15, 5 }
  0x17   : > { %3276 = vmatpush3.bf16.msra.mxu0 (!%p251_p10), %v3571_v4  ;;  %v3870_v10 = vsub.s32 (!%p251_p10), %v454_v9, %v456_v8  ;;  %vm696_vm12 = vmor (!%p251_p10), %vm694_vm5, %vm695_vm6  ;;  %s3186_s14 = sshll.u32 (!%p251_p10), %s3720_s22, 3 }
  0x18   : > { %s303_s30 = scalar_select %p302_p12, %s3720_s22, 1  ;;  %3284 = vmatpush3.bf16.msra.mxu1 %v3572_v5  ;;  %3289 = vmatprep.subr.bf16.mxu0 %v3734_v1  ;;  %vm698_vm14 = vmor %vm696_vm12, %vm697_vm8 }
  0x19   : > { %s305_s8 = scalar_select %p304_p13, %s3716_s21, 5  ;;  %3297 = vmatprep.subr.bf16.mxu1 %v3734_v1  ;;  %vm4010_vm15 = vmor %vm698_vm14, %vm699_vm13 }
  0x1a   : > { %s3865_s9 = smul.u32 36, %s303_s30  ;;  %s4877_s17 = smov (!%p3956_p0, %s311_s17), 5 }
  0x1b   : > { %s3489_s10 = smul.u32 6, %s305_s8  ;;  %s4879_s15 = smov (!%p4175_p1, %s322_s15), 5 }
  0x1d   : > { %s308_s12 = sadd.s32 %s3865_s9, %s3489_s10  ;;  %s299_s10 = sand.u32 1, %s3708_s19  }
  0x1e   : > { %s3079_s13 = sshll.u32 %s308_s12, 2  ;;  %s3491_s12 = smul.u32 6, %s4877_s17 }
  0x1f   : > { %s310_s16 = scalar_lea.vmem %s4849_s0, %s3079_s13  ;;  %s4797_s30 = scalar_lea.sflag [#allocation3], %s299_s10 }
  0x20   : > { %v3875_v11 = vld [vmem:[%s310_s16] sm:$0x7]  ;;  %v3877_v12 = vld [vmem:[%s310_s16 + $0x4] sm:$0x7]  ;;  %v3879_v13 = vld [vmem:[%s310_s16 + $0x8] sm:$0x7]  ;;  %s4037_s13 = sadd.s32 %s3491_s12, %s3865_s9 }
  0x21   : > { %v3881_v14 = vld [vmem:[%s310_s16 + $0xc] sm:$0x7]  ;;  %v3883_v15 = vld [vmem:[%s310_s16 + $0x10] sm:$0x7]  ;;  %v3885_v16 = vld [vmem:[%s310_s16 + $0x14] sm:$0x7]  ;;  %v3889_v17 = vrot.slane %v3875_v11, %v3870_v10  ;;  %v3893_v18 = vrot.slane %v3877_v12, %v3870_v10  ;;  %v3897_v19 = vrot.slane %v3879_v13, %v3870_v10  ;;  %v621_v23 = vcombine.low %v3875_v11, %v3877_v12 }
  0x22   : > { %v3901_v20 = vrot.slane %v3881_v14, %v3870_v10  ;;  %v3905_v21 = vrot.slane %v3883_v15, %v3870_v10  ;;  %v3909_v22 = vrot.slane %v3885_v16, %v3870_v10  ;;  %v622_v5 = vcombine.low %v3879_v13, %v3881_v14  ;;  %v3577_v11 = vld [vmem:[%s4852_s3 + $0x30] sm:$0xff]   ;;  %s3080_s16 = sshll.u32 %s4037_s13, 2  ;;  %s3492_s12 = smul.u32 6, %s4879_s15 }
  0x23   : > { %v3915_v24 = vcombine.high %v3889_v17, %v3889_v17  ;;  %v3919_v25 = vcombine.high %v3893_v18, %v3893_v18  ;;  %v3923_v26 = vcombine.high %v3897_v19, %v3897_v19  ;;  %v492_v27 = vshrl.u32 %v3889_v17, 16  ;;  %s4078_s8 = scalar_lea.vmem %s4850_s1, %s3080_s16  ;;  %s3185_s13 = sshll.u32 %s3716_s21, 1 }
  0x24   : > { %v3930_v28 = vcombine.high %v3901_v20, %v3901_v20  ;;  %v495_v29 = vshll.u32 %v3889_v17, 16  ;;  %v506_v30 = vshrl.u32 %v3893_v18, 16  ;;  %v509_v31 = vshll.u32 %v3893_v18, 16  ;;  %s4282_s26 = sadd.s32 %s3492_s12, %s3865_s9  ;;  %s3078_s12 = sshll.u32 %s299_s10, 3 }
  0x25   : > { %v494_v32 = vrot.slane %v492_v27, 6  ;;  %v501_v33 = vshll.u32 %v3915_v24, 16  ;;  %v515_v34 = vshll.u32 %v3919_v25, 16  ;;  %v520_v35 = vshrl.u32 %v3897_v19, 16  ;;  %s3081_s27 = sshll.u32 %s4282_s26, 2  ;;  %s2943_s26 = sadd.s32 %s3186_s14, %s3185_s13 }
  0x26   : > { %v497_v36 = vrot.slane %v495_v29, 7  ;;  %v508_v37 = vrot.slane %v506_v30, 6  ;;  %v511_v38 = vrot.slane %v509_v31, 7  ;;  %v523_v39 = vshll.u32 %v3897_v19, 16  ;;  %s4350_s17 = scalar_lea.vmem %s4851_s2, %s3081_s27  ;;  %s301_s9 = scalar_lea.vmem [#allocation2], %s3078_s12 }
  0x27   : > { %v503_v40 = vrot.slane %v501_v33, 7  ;;  %v517_v41 = vrot.slane %v515_v34, 7  ;;  %v522_v42 = vrot.slane %v520_v35, 6  ;;  %v529_v43 = vshll.u32 %v3923_v26, 16  ;;  %s2946_s15 = sshll.u32 %s301_s9, 4  ;;  %s3737_s13 = smov [#allocation2]   ;;  %s4795_s15 = int_to_ptr.vmem [resolvable:$true] %s2946_s15 }
  0x28   : > { %v498_v44 = vor.u32 %v497_v36, %v494_v32  ;;  %v512_v45 = vor.u32 %v511_v38, %v508_v37  ;;  %v525_v46 = vrot.slane %v523_v39, 7  ;;  %v534_v47 = vshrl.u32 %v3901_v20, 16  ;;  %s3638_s12 = scalar_lea.vmem %s4795_s15, 128  ;;  %s3642_s14 = sshll.u32 %s3737_s13, 4  ;;  %s3643_s14 = int_to_ptr.vmem [resolvable:$false] %s3642_s14 }
  0x29   : > { %v531_v49 = vrot.slane %v529_v43, 7  ;;  %v537_v50 = vshll.u32 %v3901_v20, 16  ;;  %v543_v51 = vshll.u32 %v3930_v28, 16  ;;  %v3952_v52 = vcombine.high %v3905_v21, %v3905_v21  ;;  %p3639_p2 = scmp.ne.s32.totalorder %s4795_s15, %s3638_s12  ;;  %p3645_p6 = scmp.lt.s32.totalorder %s4795_s15, %s3643_s14 }
  0x2a   : > { %v499_v53 = vrot.slane %v498_v44, 2  ;;  %v513_v54 = vrot.slane %v512_v45, 2  ;;  %v526_v55 = vor.u32 %v525_v46, %v522_v42  ;;  %v536_v56 = vrot.slane %v534_v47, 6  ;;  %v3576_v45 = vld [vmem:[%s4852_s3 + $0x20] sm:$0xff]  }
  0x2b   : > { %v539_v57 = vrot.slane %v537_v50, 7  ;;  %v545_v58 = vrot.slane %v543_v51, 7  ;;  %v877_v59 = vshrl.u32 %v3905_v21, 16  ;;  %v880_v60 = vshll.u32 %v3905_v21, 16  ;;  %p3640_p4 = pnand %p3639_p2, %p3821_p3 }
  0x2c   : > { %v504_v61 = vsel %vm3944_vm10, %v499_v53, %v503_v40  ;;  %v3966_v62 = vsel %vm3944_vm10, %v513_v54, %v517_v41  ;;  %v527_v63 = vrot.slane %v526_v55, 2  ;;  %v886_v0 = vshll.u32 %v3952_v52, 16 }
  0x2d   : > { %v540_v2 = vor.u32 %v539_v57, %v536_v56  ;;  %v879_v3 = vrot.slane %v877_v59, 6  ;;  %v882_v4 = vrot.slane %v880_v60, 7  ;;  %v547_v6 = vcombine.low %v504_v61, %v3966_v62  ;;  %p3641_p5 = pneg %p3640_p4 }
  0x2e   : > { %v3976_v7 = vcombine.high %v3909_v22, %v3909_v22  ;;  %v1121_v8 = vshrl.u32 %v3909_v22, 16  ;;  %v3981_v9 = vsel %vm3944_vm10, %v527_v63, %v531_v49  ;;  %v1124_v31 = vshll.u32 %v3909_v22, 16 }
  0x2f   : > { %v541_v27 = vrot.slane %v540_v2, 2  ;;  %v883_v29 = vor.u32 %v882_v4, %v879_v3  ;;  %v629_v33 = vrot.slane %v621_v23, %v3870_v10  ;;  %v888_v36 = vrot.slane %v886_v0, 7  ;;  %v3583_v4 = vld [vmem:[%s4852_s3 + $0x50] sm:$0xff]  }
  0x30   : > { %v1123_v30 = vrot.slane %v1121_v8, 6  ;;  %v1130_v32 = vshll.u32 %v3976_v7, 16  ;;  %v4001_v37 = vrot.slane %v622_v5, %v3870_v10  ;;  %v555_v39 = vrot.slane %v547_v6, %v3870_v10 }
  0x31   : > { %v3998_v34 = vsel %vm3944_vm10, %v541_v27, %v545_v58  ;;  %v884_v35 = vrot.slane %v883_v29, 2  ;;  %v1126_v40 = vrot.slane %v1124_v31, 7  ;;  %v3088_v41 = vrot.slane %v3889_v17, 9 }
  0x32   : > { %v548_v38 = vcombine.low %v3981_v9, %v3998_v34  ;;  %v890_v42 = vcombine.low %v3966_v62, %v3981_v9  ;;  %v637_v43 = vcombine.low %v629_v33, %v4001_v37  ;;  %v1045_v44 = vcombine.low %v3883_v15, %v3885_v16 }
  0x33   : > { %v703_v46 = vrot.slane %v3915_v24, 7  ;;  %v1127_v17 = vor.u32 %v1126_v40, %v1123_v30  ;;  %v1132_v49 = vrot.slane %v1130_v32, 7  ;;  %v3089_v50 = vrot.slane %v3893_v18, 9  ;;  %v3579_v18 = vld [vmem:[%s4852_s3 + $0x38] sm:$0xff]   ;;  %v4130_v40 = vld [vmem:[%s4078_s8 + $0xc] sm:$0x7] }
  0x34   : > { %v4026_v47 = vrot.slane %v548_v38, %v3870_v10  ;;  %v889_v51 = vsel %vm3944_vm10, %v884_v35, %v888_v36  ;;  %3286 = vmatmul.mubr.msk.bf16.vlgmr.msra.gmra.mrb[0].mxu1 %vm576_vm11, %v637_v43  ;;  %v707_v53 = vrot.slane %v3919_v25, 7  ;;  %v3090_v24 = vrot.slane %v3897_v19, 9  ;;  %v4116_v35 = vld [vmem:[%s4078_s8 + $0x4] sm:$0x7]  ;;  %v4122_v36 = vld [vmem:[%s4078_s8 + $0x8] sm:$0x7] }
  0x35   : > { %v704_v16 = vsel %vm4010_vm15, %v3088_v41, %v703_v46  ;;  %v1128_v55 = vrot.slane %v1127_v17, 2  ;;  %3298 = vmatpush3.bf16.msra.mxu1 %v3577_v11  ;;  %v711_v56 = vrot.slane %v3923_v26, 7  ;;  %v3091_v57 = vrot.slane %v3901_v20, 9  ;;  %3301 = vmatprep.mubr.msk.bf16.mxu1 %vm3735_vm0, %v3734_v1 }
  0x36   : > { %v563_v54 = vcombine.low %v555_v39, %v4026_v47  ;;  %3299 = vmatprep.subr.bf16.mxu1 %v3734_v1  ;;  %v708_v19 = vsel %vm4010_vm15, %v3089_v50, %v707_v53  ;;  %v715_v25 = vrot.slane %v3930_v28, 7  ;;  %v793_v58 = vcombine.low %v3877_v12, %v3879_v13  ;;  %v3578_v12 = vld [vmem:[%s4852_s3 + $0x28] sm:$0xff]  }
  0x37   : > { %v794_v59 = vcombine.low %v3881_v14, %v3883_v15  ;;  %v891_v20 = vcombine.low %v3998_v34, %v889_v51  ;;  %v1133_v26 = vsel %vm3944_vm10, %v1128_v55, %v1132_v49  ;;  %v712_v60 = vsel %vm4010_vm15, %v3090_v24, %v711_v56  ;;  %v4113_v34 = vld [vmem:[%s4078_s8] sm:$0x7] }
  0x38   : > { %3278 = vmatmul.mubr.msk.bf16.vlgmr.msra.gmra.mrb[0].mxu0 %vm576_vm11, %v563_v54  ;;  %v717_v61 = vcombine.low %v704_v16, %v708_v19  ;;  %v1134_v62 = vcombine.low %v889_v51, %v1133_v26  ;;  %v716_v13 = vsel %vm4010_vm15, %v3091_v57, %v715_v25  ;;  %v801_v14 = vrot.slane %v793_v58, %v3870_v10  ;;  %v3587_v51 = vld [vmem:[%s4852_s3 + $0x70] sm:$0xff]   ;;  %v3586_v55 = vld [vmem:[%s4852_s3 + $0x60] sm:$0xff]  }
  0x39   : > { %3290 = vmatpush3.bf16.msra.mxu0 %v3576_v45  ;;  %3293 = vmatprep.mubr.msk.bf16.mxu0 %vm3735_vm0, %v3734_v1  ;;  %v3101_v15 = vrot.slane %v3905_v21, 9  ;;  %v718_v28 = vcombine.low %v712_v60, %v716_v13  ;;  %v808_v0 = vrot.slane %v794_v59, %v3870_v10  ;;  %v967_v2 = vrot.slane %v3952_v52, 7  ;;  %v3580_v21 = vld [vmem:[%s4852_s3 + $0x40] sm:$0xff]  }
  0x3a   : > { %3291 = vmatprep.subr.bf16.mxu0 %v3734_v1  ;;  %3300 = vmatpush3.bf16.msra.mxu1 %v3579_v18  ;;  %v725_v63 = vrot.slane %v717_v61, %v3870_v10  ;;  %v4081_v3 = vrot.slane %v1045_v44, %v3870_v10  ;;  %v4091_v52 = vrot.slane %v890_v42, %v3870_v10  ;;  %v3111_v6 = vrot.slane %v3909_v22, 9  ;;  %v3585_v22 = vld [vmem:[%s4852_s3 + $0x58] sm:$0xff]   ;;  %v3584_v44 = vld [vmem:[%s4852_s3 + $0x48] sm:$0xff]  }
  0x3b   : > { %3313 = vmatprep.subr.bf16.mxu1 %v3734_v1  ;;  %v969_v5 = vcombine.low %v708_v19, %v712_v60  ;;  %v4095_v8 = vrot.slane %v718_v28, %v3870_v10  ;;  %v809_v9 = vcombine.low %v801_v14, %v808_v0  ;;  %v4099_v27 = vsel %vm4010_vm15, %v3101_v15, %v967_v2 }
  0x3c   : > { %v1203_v29 = vrot.slane %v3976_v7, 7  ;;  %v1141_v30 = vrot.slane %v1134_v62, %v3870_v10  ;;  %v4108_v31 = vrot.slane %v891_v20, %v3870_v10  ;;  %v970_v32 = vcombine.low %v716_v13, %v4099_v27  ;;  %v3589_v13 = vld [vmem:[%s4852_s3 + $0x78] sm:$0xff]  }
  0x3d   : > { %3292 = vmatpush3.bf16.msra.mxu0 %v3578_v12  ;;  %v977_v33 = vrot.slane %v969_v5, %v3870_v10  ;;  %v733_v7 = vcombine.low %v725_v63, %v4095_v8  ;;  %3302 = vmatmul.mubr.msk.bf16.vlgmr.msra.gmra.mrb[4].mxu1 %vm576_vm11, %v809_v9  ;;  %v1053_v38 = vcombine.low %v4001_v37, %v4081_v3  ;;  %v3588_v12 = vld [vmem:[%s4852_s3 + $0x68] sm:$0xff]  }
  0x3e   : > { %3305 = vmatprep.subr.bf16.mxu0 %v3734_v1  ;;  %3314 = vmatpush3.bf16.msra.mxu1 %v3583_v4  ;;  %v984_v39 = vrot.slane %v970_v32, %v3870_v10  ;;  %v4136_v11 = vsel %vm4010_vm15, %v3111_v6, %v1203_v29  ;;  %v4140_v41 = vrot.slane %v4113_v34, %v3870_v10  ;;  %v3592_v37 = vld [vmem:[%s4852_s3 + $0x88] sm:$0xff]  }
  0x3f   : > { %3317 = vmatprep.mubr.msk.bf16.mxu1 %vm3735_vm0, %v3734_v1  ;;  %3315 = vmatprep.subr.bf16.mxu1 %v3734_v1  ;;  %v4144_v42 = vrot.slane %v4116_v35, %v3870_v10  ;;  %v4147_v43 = vcombine.low %v4026_v47, %v1141_v30  ;;  %v906_v45 = vcombine.low %v4091_v52, %v4108_v31  ;;  %v3591_v52 = vld [vmem:[%s4852_s3 + $0x90] sm:$0xff]  }
  0x40   : > { %3294 = vmatmul.mubr.msk.bf16.vlgmr.msra.gmra.mrb[4].mxu0 %vm576_vm11, %v733_v7  ;;  %v985_v46 = vcombine.low %v977_v33, %v984_v39  ;;  %v4159_v17 = vrot.slane %v4122_v36, %v3870_v10  ;;  %v4163_v47 = vrot.slane %v4130_v40, %v3870_v10  ;;  %v4167_v49 = vcombine.high %v4140_v41, %v4140_v41 }
  0x41   : > { %3306 = vmatpush3.bf16.msra.mxu0 %v3580_v21  ;;  %3309 = vmatprep.mubr.msk.bf16.mxu0 %vm3735_vm0, %v3734_v1  ;;  %v4171_v50 = vcombine.high %v4144_v42, %v4144_v42  ;;  %v1205_v16 = vcombine.low %v4099_v27, %v4136_v11  ;;  %v1282_v53 = vcombine.low %v4113_v34, %v4116_v35  ;;  %v1390_v24 = vshrl.u32 %v4140_v41, 16 }
  0x42   : > { %3307 = vmatprep.subr.bf16.mxu0 %v3734_v1  ;;  %3316 = vmatpush3.bf16.msra.mxu1 %v3585_v22  ;;  %v1393_v54 = vshll.u32 %v4140_v41, 16  ;;  %v4194_v18 = vcombine.high %v4159_v17, %v4159_v17  ;;  %v4198_v56 = vcombine.high %v4163_v47, %v4163_v47  ;;  %v1399_v57 = vshll.u32 %v4167_v49, 16 }
  0x43   : > { %3329 = vmatprep.subr.bf16.mxu1 %v3734_v1  ;;  %v1404_v19 = vshrl.u32 %v4144_v42, 16  ;;  %v1392_v25 = vrot.slane %v1390_v24, 6  ;;  %v1407_v59 = vshll.u32 %v4144_v42, 16  ;;  %v1413_v20 = vshll.u32 %v4171_v50, 16 }
  0x44   : > { %v1395_v58 = vrot.slane %v1393_v54, 7  ;;  %v1283_v26 = vcombine.low %v4122_v36, %v4130_v40  ;;  %v1418_v61 = vshrl.u32 %v4159_v17, 16  ;;  %v1421_v62 = vshll.u32 %v4159_v17, 16 }
  0x45   : > { %3308 = vmatpush3.bf16.msra.mxu0 %v3584_v44  ;;  %3318 = vmatmul.mubr.msk.bf16.vlgmr.msra.gmra.mrb[8].mxu1 %vm576_vm11, %v985_v46  ;;  %v1406_v60 = vrot.slane %v1404_v19, 6  ;;  %v4224_v15 = vrot.slane %v1399_v57, 7  ;;  %v1409_v28 = vrot.slane %v1407_v59, 7  ;;  %v1427_v63 = vshll.u32 %v4194_v18, 16 }
  0x46   : > { %3321 = vmatprep.subr.bf16.mxu0 %v3734_v1  ;;  %3330 = vmatpush3.bf16.msra.mxu1 %v3587_v51  ;;  %v1396_v14 = vor.u32 %v1395_v58, %v1392_v25  ;;  %v1420_v0 = vrot.slane %v1418_v61, 6  ;;  %v1423_v2 = vrot.slane %v1421_v62, 7  ;;  %v1432_v21 = vshrl.u32 %v4163_v47, 16 }
  0x47   : > { %3333 = vmatprep.mubr.msk.bf16.mxu1 %vm3735_vm0, %v3734_v1  ;;  %3331 = vmatprep.subr.bf16.mxu1 %v3734_v1  ;;  %v1435_v4 = vshll.u32 %v4163_v47, 16  ;;  %v1410_v6 = vor.u32 %v1409_v28, %v1406_v60  ;;  %v1415_v9 = vrot.slane %v1413_v20, 7  ;;  %v1441_v29 = vshll.u32 %v4198_v56, 16  ;;  %v3597_v20 = vld [vmem:[%s4852_s3 + $0xb0] sm:$0xff]  }
  0x48   : > { %3310 = vmatmul.mubr.msk.bf16.vlgmr.msra.gmra.mrb[8].mxu0 %vm576_vm11, %v906_v45  ;;  %v1397_v5 = vrot.slane %v1396_v14, 2  ;;  %v1424_v30 = vor.u32 %v1423_v2, %v1420_v0  ;;  %v1434_v22 = vrot.slane %v1432_v21, 6  ;;  %v3121_v32 = vrot.slane %v4140_v41, 9  ;;  %v3590_v45 = vld [vmem:[%s4852_s3 + $0x80] sm:$0xff]   ;;  %v3599_v0 = vld [vmem:[%s4852_s3 + $0xb8] sm:$0xff]  }
  0x49   : > { %3322 = vmatpush3.bf16.msra.mxu0 %v3586_v55  ;;  %3325 = vmatprep.mubr.msk.bf16.mxu0 %vm3735_vm0, %v3734_v1  ;;  %v1437_v31 = vrot.slane %v1435_v4, 7  ;;  %v1411_v33 = vrot.slane %v1410_v6, 2  ;;  %v1429_v7 = vrot.slane %v1427_v63, 7  ;;  %v1443_v39 = vrot.slane %v1441_v29, 7  ;;  %v3594_v14 = vld [vmem:[%s4852_s3 + $0xa0] sm:$0xff]  }
  0x4a   : > { %3323 = vmatprep.subr.bf16.mxu0 %v3734_v1  ;;  %3332 = vmatpush3.bf16.msra.mxu1 %v3589_v13  ;;  %v1522_v44 = vrot.slane %v4167_v49, 7  ;;  %v1425_v46 = vrot.slane %v1424_v30, 2  ;;  %v3122_v24 = vrot.slane %v4144_v42, 9  ;;  %v1526_v41 = vrot.slane %v4171_v50, 7  ;;  %v4250_v49 = vld [vmem:[%s4078_s8 + $0x10] sm:$0x7] }
  0x4b   : > { %3345 = vmatprep.subr.bf16.mxu1 %v3734_v1  ;;  %v1438_v51 = vor.u32 %v1437_v31, %v1434_v22  ;;  %v3123_v54 = vrot.slane %v4159_v17, 9  ;;  %v1530_v55 = vrot.slane %v4194_v18, 7  ;;  %v3593_v42 = vld [vmem:[%s4852_s3 + $0x98] sm:$0xff]   ;;  %v1290_v17 = vrot.slane %v1282_v53, %v3870_v10  ;;  %v4382_v30 = vld [vmem:[%s4350_s17] sm:$0x7] }
  0x4c   : > { %v4263_v50 = vrot.slane %v1283_v26, %v3870_v10  ;;  %v1523_v57 = vsel %vm4010_vm15, %v3121_v32, %v1522_v44  ;;  %v3124_v34 = vrot.slane %v4163_v47, 9  ;;  %v1534_v53 = vrot.slane %v4198_v56, 7 }
  0x4d   : > { %3324 = vmatpush3.bf16.msra.mxu0 %v3588_v12  ;;  %3334 = vmatmul.mubr.msk.bf16.vlgmr.msra.gmra.mrb[12].mxu1 %vm576_vm11, %v4147_v43  ;;  %v1439_v18 = vrot.slane %v1438_v51, 2  ;;  %v4271_v43 = vsel %vm4010_vm15, %v3122_v24, %v1526_v41  ;;  %v4275_v19 = vsel %vm4010_vm15, %v3123_v54, %v1530_v55  ;;  %v1212_v25 = vrot.slane %v1205_v16, %v3870_v10  ;;  %v3601_v51 = vld [vmem:[%s4852_s3 + $0xd0] sm:$0xff]  }
  0x4e   : > { %3337 = vmatprep.subr.bf16.mxu0 %v3734_v1  ;;  %3346 = vmatpush3.bf16.msra.mxu1 %v3591_v52  ;;  %v1402_v47 = vsel %vm3944_vm10, %v1397_v5, %v4224_v15  ;;  %v4298_v56 = vsel %vm3944_vm10, %v1411_v33, %v1415_v9  ;;  %v4307_v3 = vsel %vm3944_vm10, %v1425_v46, %v1429_v7  ;;  %v3598_v52 = vld [vmem:[%s4852_s3 + $0xa8] sm:$0xff]   ;;  %v4398_v46 = vld [vmem:[%s4350_s17 + $0x4] sm:$0x7] }
  0x4f   : > { %3349 = vmatprep.mubr.msk.bf16.mxu1 %vm3735_vm0, %v3734_v1  ;;  %3347 = vmatprep.subr.bf16.mxu1 %v3734_v1  ;;  %v4311_v27 = vsel %vm3944_vm10, %v1439_v18, %v1443_v39  ;;  %v1298_v11 = vcombine.low %v1290_v17, %v4263_v50  ;;  %v1536_v16 = vcombine.low %v1523_v57, %v4271_v43  ;;  %v4410_v57 = vld [vmem:[%s4350_s17 + $0x8] sm:$0x7] }
  0x50   : > { %3326 = vmatmul.mubr.msk.bf16.vlgmr.msra.gmra.mrb[12].mxu0 %vm576_vm11, %v1053_v38  ;;  %v4315_v38 = vsel %vm4010_vm15, %v3124_v34, %v1534_v53  ;;  %v4324_v59 = vrot.slane %v4250_v49, %v3870_v10  ;;  %v1445_v26 = vcombine.low %v1402_v47, %v4298_v56  ;;  %v1612_v60 = vcombine.low %v4116_v35, %v4122_v36  ;;  %v1277_v36 = vld [vmem:[%s4078_s8 + $0x14] sm:$0x7]  ;;  %v3600_v34 = vld [vmem:[%s4852_s3 + $0xc0] sm:$0xff]   ;;  %s3187_s8 = sshll.u32 %s2943_s26, 6 }
  0x51   : > { %3338 = vmatpush3.bf16.msra.mxu0 %v3590_v45  ;;  %3341 = vmatprep.mubr.msk.bf16.mxu0 %vm3735_vm0, %v3734_v1  ;;  %v1537_v58 = vcombine.low %v4275_v19, %v4315_v38  ;;  %v1213_v61 = vcombine.low %v4095_v8, %v1212_v25  ;;  %v1446_v62 = vcombine.low %v4307_v3, %v4311_v27  ;;  %s4793_s27 = scalar_lea.hbm %s4854_s5, %s3187_s8 }
  0x52   : > { %3339 = vmatprep.subr.bf16.mxu0 %v3734_v1  ;;  %3348 = vmatpush3.bf16.msra.mxu1 %v3593_v42  ;;  %v1694_v12 = vcombine.high %v4324_v59, %v4324_v59  ;;  %v1696_v13 = vshrl.u32 %v4324_v59, 16  ;;  %v1613_v35 = vcombine.low %v4130_v40, %v4250_v49  ;;  %v1699_v8 = vshll.u32 %v4324_v59, 16 }
  0x53   : > { %3361 = vmatprep.subr.bf16.mxu1 %v3734_v1  ;;  %v1544_v15 = vrot.slane %v1536_v16, %v3870_v10  ;;  %v4356_v28 = vrot.slane %v1537_v58, %v3870_v10  ;;  %v1453_v2 = vrot.slane %v1445_v26, %v3870_v10  ;;  %v4365_v21 = vrot.slane %v1612_v60, %v3870_v10  ;;  %v3602_v60 = vld [vmem:[%s4852_s3 + $0xc8] sm:$0xff]  }
  0x54   : > { %v1698_v63 = vrot.slane %v1696_v13, 6  ;;  %v1705_v40 = vshll.u32 %v1694_v12, 16  ;;  %v1701_v4 = vrot.slane %v1699_v8, 7  ;;  %v4373_v5 = vrot.slane %v1446_v62, %v3870_v10 }
  0x55   : > { %3340 = vmatpush3.bf16.msra.mxu0 %v3592_v37  ;;  %3350 = vmatmul.mubr.msk.bf16.vlgmr.msra.gmra.mrb[16].mxu1 %vm576_vm11, %v1298_v11  ;;  %v1709_v6 = vcombine.low %v4298_v56, %v4307_v3  ;;  %v3134_v9 = vrot.slane %v4324_v59, 9  ;;  %v4379_v29 = vrot.slane %v1277_v36, %v3870_v10  ;;  %v4387_v22 = vrot.slane %v1613_v35, %v3870_v10  ;;  %v4435_v37 = vld [vmem:[%s4350_s17 + $0xc] sm:$0x7]  ;;  %v3603_v3 = vld [vmem:[%s4852_s3 + $0xd8] sm:$0xff]  }
  0x56   : > { %3353 = vmatprep.subr.bf16.mxu0 %v3734_v1  ;;  %3362 = vmatpush3.bf16.msra.mxu1 %v3597_v20  ;;  %v1702_v31 = vor.u32 %v1701_v4, %v1698_v63  ;;  %v1707_v32 = vrot.slane %v1705_v40, 7  ;;  %v1786_v33 = vrot.slane %v1694_v12, 7  ;;  %v1552_v7 = vcombine.low %v1544_v15, %v4356_v28 }
  0x57   : > { %3365 = vmatprep.mubr.msk.bf16.mxu1 %vm3735_vm0, %v3734_v1  ;;  %3363 = vmatprep.subr.bf16.mxu1 %v3734_v1  ;;  %v4393_v39 = vcombine.high %v4379_v29, %v4379_v29  ;;  %v1940_v44 = vshrl.u32 %v4379_v29, 16  ;;  %v1943_v45 = vshll.u32 %v4379_v29, 16  ;;  %v1788_v41 = vcombine.low %v4271_v43, %v4275_v19 }
  0x58   : > { %3342 = vmatmul.mubr.msk.bf16.vlgmr.msra.gmra.mrb[16].mxu0 %vm576_vm11, %v1213_v61  ;;  %v1703_v24 = vrot.slane %v1702_v31, 2  ;;  %v1864_v54 = vcombine.low %v4250_v49, %v1277_v36  ;;  %v1461_v55 = vcombine.low %v1453_v2, %v4373_v5  ;;  %v1717_v42 = vrot.slane %v1709_v6, %v3870_v10  ;;  %v3607_v36 = vld [vmem:[%s4852_s3 + $0xf0] sm:$0xff]   ;;  %v3606_v6 = vld [vmem:[%s4852_s3 + $0xe0] sm:$0xff]  }
  0x59   : > { %3354 = vmatpush3.bf16.msra.mxu0 %v3594_v14  ;;  %3357 = vmatprep.mubr.msk.bf16.mxu0 %vm3735_vm0, %v3734_v1  ;;  %v1942_v17 = vrot.slane %v1940_v44, 6  ;;  %v1945_v18 = vrot.slane %v1943_v45, 7  ;;  %v4421_v49 = vsel %vm4010_vm15, %v3134_v9, %v1786_v33  ;;  %v1949_v19 = vshll.u32 %v4393_v39, 16  ;;  %v3609_v44 = vld [vmem:[%s4852_s3 + $0xf8] sm:$0xff]  }
  0x5a   : > { %3355 = vmatprep.subr.bf16.mxu0 %v3734_v1  ;;  %3364 = vmatpush3.bf16.msra.mxu1 %v3599_v0  ;;  %v4417_v43 = vsel %vm3944_vm10, %v1703_v24, %v1707_v32  ;;  %v4426_v53 = vrot.slane %v4382_v30, %v3870_v10  ;;  %v1628_v25 = vcombine.low %v4365_v21, %v4387_v22  ;;  %v3144_v12 = vrot.slane %v4379_v29, 9 }
  0x5b   : > { %3377 = vmatprep.subr.bf16.mxu1 %v3734_v1  ;;  %v1710_v47 = vcombine.low %v4311_v27, %v4417_v43  ;;  %v1946_v56 = vor.u32 %v1945_v18, %v1942_v17  ;;  %v4443_v11 = vrot.slane %v1788_v41, %v3870_v10  ;;  %v4446_v16 = vrot.slane %v1864_v54, %v3870_v10  ;;  %v3608_v18 = vld [vmem:[%s4852_s3 + $0xe8] sm:$0xff]  }
  0x5c   : > { %v4450_v27 = vrot.slane %v4398_v46, %v3870_v10  ;;  %v2209_v58 = vshrl.u32 %v4426_v53, 16  ;;  %v1789_v20 = vcombine.low %v4315_v38, %v4421_v49  ;;  %v4460_v26 = vrot.slane %v4410_v57, %v3870_v10 }
  0x5d   : > { %3356 = vmatpush3.bf16.msra.mxu0 %v3598_v52  ;;  %3366 = vmatmul.mubr.msk.bf16.vlgmr.msra.gmra.mrb[20].mxu1 %vm576_vm11, %v1552_v7  ;;  %v1724_v59 = vrot.slane %v1710_v47, %v3870_v10  ;;  %v1947_v61 = vrot.slane %v1946_v56, 2  ;;  %v1951_v62 = vrot.slane %v1949_v19, 7  ;;  %v2022_v13 = vrot.slane %v4393_v39, 7 }
  0x5e   : > { %3369 = vmatprep.subr.bf16.mxu0 %v3734_v1  ;;  %3378 = vmatpush3.bf16.msra.mxu1 %v3601_v51  ;;  %v4472_v14 = vrot.slane %v4435_v37, %v3870_v10  ;;  %v4476_v35 = vcombine.high %v4426_v53, %v4426_v53  ;;  %v4480_v8 = vcombine.high %v4450_v27, %v4450_v27  ;;  %v2211_v63 = vrot.slane %v2209_v58, 6 }
  0x5f   : > { %3381 = vmatprep.mubr.msk.bf16.mxu1 %vm3735_vm0, %v3734_v1  ;;  %3379 = vmatprep.subr.bf16.mxu1 %v3734_v1  ;;  %v1725_v38 = vcombine.low %v1717_v42, %v1724_v59  ;;  %v4487_v15 = vcombine.high %v4460_v26, %v4460_v26  ;;  %v2212_v40 = vshll.u32 %v4426_v53, 16  ;;  %v2223_v0 = vshrl.u32 %v4450_v27, 16  ;;  %v3612_v59 = vld [vmem:[%s4852_s3 + $0x110] sm:$0xff]  }
  0x60   : > { %3358 = vmatmul.mubr.msk.bf16.vlgmr.msra.gmra.mrb[20].mxu0 %vm576_vm11, %v1461_v55  ;;  %v4493_v2 = vrot.slane %v1789_v20, %v3870_v10  ;;  %v4497_v21 = vcombine.high %v4472_v14, %v4472_v14  ;;  %v2226_v4 = vshll.u32 %v4450_v27, 16  ;;  %v2237_v52 = vshrl.u32 %v4460_v26, 16 }
  0x61   : > { %3370 = vmatpush3.bf16.msra.mxu0 %v3600_v34  ;;  %3373 = vmatprep.mubr.msk.bf16.mxu0 %vm3735_vm0, %v3734_v1  ;;  %v1952_v9 = vsel %vm3944_vm10, %v1947_v61, %v1951_v62  ;;  %v2023_v29 = vsel %vm4010_vm15, %v3144_v12, %v2022_v13  ;;  %v2214_v22 = vrot.slane %v2212_v40, 7  ;;  %v2225_v31 = vrot.slane %v2223_v0, 6  ;;  %v3610_v12 = vld [vmem:[%s4852_s3 + $0x100] sm:$0xff]  }
  0x62   : > { %3371 = vmatprep.subr.bf16.mxu0 %v3734_v1  ;;  %3380 = vmatpush3.bf16.msra.mxu1 %v3603_v3  ;;  %v2218_v32 = vshll.u32 %v4476_v35, 16  ;;  %v2228_v33 = vrot.slane %v2226_v4, 7  ;;  %v2239_v7 = vrot.slane %v2237_v52, 6  ;;  %v2240_v39 = vshll.u32 %v4460_v26, 16  ;;  %v3613_v52 = vld [vmem:[%s4852_s3 + $0x108] sm:$0xff]  }
  0x63   : > { %3393 = vmatprep.subr.bf16.mxu1 %v3734_v1  ;;  %v2215_v45 = vor.u32 %v2214_v22, %v2211_v63  ;;  %v2232_v51 = vshll.u32 %v4480_v8, 16  ;;  %v2246_v24 = vshll.u32 %v4487_v15, 16  ;;  %v2251_v41 = vshrl.u32 %v4472_v14, 16 }
  0x64   : > { %v2229_v54 = vor.u32 %v2228_v33, %v2225_v31  ;;  %v2242_v55 = vrot.slane %v2240_v39, 7  ;;  %v2254_v42 = vshll.u32 %v4472_v14, 16  ;;  %v2260_v17 = vshll.u32 %v4497_v21, 16 }
  0x65   : > { %3372 = vmatpush3.bf16.msra.mxu0 %v3602_v60  ;;  %3382 = vmatmul.mubr.msk.bf16.vlgmr.msra.gmra.mrb[24].mxu1 %vm576_vm11, %v1725_v38  ;;  %v1872_v34 = vcombine.low %v4263_v50, %v4446_v16  ;;  %v2024_v19 = vcombine.low %v4421_v49, %v2023_v29  ;;  %v1953_v47 = vcombine.low %v4417_v43, %v1952_v9  ;;  %v2220_v56 = vrot.slane %v2218_v32, 7 }
  0x66   : > { %3385 = vmatprep.subr.bf16.mxu0 %v3734_v1  ;;  %3394 = vmatpush3.bf16.msra.mxu1 %v3607_v36  ;;  %v2243_v3 = vor.u32 %v2242_v55, %v2239_v7  ;;  %v2256_v58 = vrot.slane %v2254_v42, 7  ;;  %v2216_v20 = vrot.slane %v2215_v45, 2  ;;  %v2230_v60 = vrot.slane %v2229_v54, 2  ;;  %v3614_v36 = vld [vmem:[%s4852_s3 + $0x118] sm:$0xff]  }
  0x67   : > { %3397 = vmatprep.mubr.msk.bf16.mxu1 %vm3735_vm0, %v3734_v1  ;;  %3395 = vmatprep.subr.bf16.mxu1 %v3734_v1  ;;  %v2234_v61 = vrot.slane %v2232_v51, 7  ;;  %v2248_v62 = vrot.slane %v2246_v24, 7  ;;  %v1804_v50 = vcombine.low %v4443_v11, %v4493_v2  ;;  %v2262_v16 = vrot.slane %v2260_v17, 7  ;;  %v4563_v2 = vld [vmem:[%s4350_s17 + $0x10] sm:$0x7] }
  0x68   : > { %3374 = vmatmul.mubr.msk.bf16.vlgmr.msra.gmra.mrb[24].mxu0 %vm576_vm11, %v1628_v25  ;;  %v2253_v25 = vrot.slane %v2251_v41, 6  ;;  %v2244_v49 = vrot.slane %v2243_v3, 2  ;;  %v2031_v13 = vrot.slane %v2024_v19, %v3870_v10  ;;  %v1960_v38 = vrot.slane %v1953_v47, %v3870_v10  ;;  %v4603_v41 = vld [vmem:[%s4350_s17 + $0x14] sm:$0x7]  ;;  %s3644_s17 = scalar_lea.vmem %s3643_s14, 256 }
  0x69   : > { %3386 = vmatpush3.bf16.msra.mxu0 %v3606_v6  ;;  %3389 = vmatprep.mubr.msk.bf16.mxu0 %vm3735_vm0, %v3734_v1  ;;  %v2221_v63 = vsel %vm3944_vm10, %v2216_v20, %v2220_v56  ;;  %v4556_v40 = vsel %vm3944_vm10, %v2230_v60, %v2234_v61  ;;  %v2101_v9 = vcombine.low %v4382_v30, %v4398_v46  ;;  %v3154_v30 = vrot.slane %v4426_v53, 9  ;;  %v3615_v53 = vld [vmem:[%s4852_s3 + $0x120] sm:$0xff]   ;;  %p3646_p7 = scmp.lt.s32.totalorder %s3644_s17, %s3638_s12 }
  0x6a   : > { %3387 = vmatprep.subr.bf16.mxu0 %v3734_v1  ;;  %3396 = vmatpush3.bf16.msra.mxu1 %v3609_v44  ;;  %v2257_v43 = vor.u32 %v2256_v58, %v2253_v25  ;;  %v4560_v0 = vsel %vm3944_vm10, %v2244_v49, %v2248_v62  ;;  %v2032_v6 = vcombine.low %v4356_v28, %v2031_v13  ;;  %v3616_v28 = vld [vmem:[%s4852_s3 + $0x130] sm:$0xff]   ;;  %v2341_v7 = vrot.slane %v4476_v35, 7  ;;  %v3617_v25 = vld [vmem:[%s4852_s3 + $0x128] sm:$0xff]   ;;  %v3621_v13 = vld [vmem:[%s4852_s3 + $0x140] sm:$0xff]  }
  0x6b   : > { %3409 = vmatprep.subr.bf16.mxu1 %v3734_v1  ;;  %v2102_v29 = vcombine.low %v4410_v57, %v4435_v37  ;;  %v1961_v22 = vcombine.low %v4373_v5, %v1960_v38  ;;  %v2264_v31 = vcombine.low %v2221_v63, %v4556_v40  ;;  %v4588_v33 = vrot.slane %v4563_v2, %v3870_v10  ;;  %v3622_v62 = vld [vmem:[%s4852_s3 + $0x150] sm:$0xff]   ;;  %p3647_p9 = por %p3646_p7, %p3645_p6 }
  0x6c   : > { %v2258_v11 = vrot.slane %v2257_v43, 2  ;;  %v3155_v5 = vrot.slane %v4450_v27, 9  ;;  %v2345_v39 = vrot.slane %v4480_v8, 7  ;;  %v3156_v44 = vrot.slane %v4460_v26, 9 }
  0x6d   : > { %3388 = vmatpush3.bf16.msra.mxu0 %v3608_v18  ;;  %3398 = vmatmul.mubr.msk.bf16.vlgmr.msra.gmra.mrb[28].mxu1 %vm576_vm11, %v1872_v34  ;;  %v2349_v45 = vrot.slane %v4487_v15, 7  ;;  %v2515_v51 = vshrl.u32 %v4588_v33, 16  ;;  %v2518_v24 = vshll.u32 %v4588_v33, 16  ;;  %v3157_v27 = vrot.slane %v4472_v14, 9  ;;  %v3618_v14 = vld [vmem:[%s4852_s3 + $0x138] sm:$0xff]   ;;  %p3648_p10 = pnand %p3647_p9, %p3641_p5 }
  0x6e   : > { %3401 = vmatprep.subr.bf16.mxu0 %v3734_v1  ;;  %3410 = vmatpush3.bf16.msra.mxu1 %v3612_v59  ;;  %v4569_v4 = vsel %vm3944_vm10, %v2258_v11, %v2262_v16  ;;  %v2353_v35 = vrot.slane %v4497_v21, 7  ;;  %v2513_v26 = vcombine.high %v4588_v33, %v4588_v33  ;;  %v2272_v8 = vrot.slane %v2264_v31, %v3870_v10 }
  0x6f   : > { %3413 = vmatprep.mubr.msk.bf16.mxu1 %vm3735_vm0, %v3734_v1  ;;  %3411 = vmatprep.subr.bf16.mxu1 %v3734_v1  ;;  %v2265_v32 = vcombine.low %v4560_v0, %v4569_v4  ;;  %v2517_v54 = vrot.slane %v2515_v51, 6  ;;  %v2520_v55 = vrot.slane %v2518_v24, 7  ;;  %v2109_v21 = vrot.slane %v2101_v9, %v3870_v10 }
  0x70   : > { %3390 = vmatmul.mubr.msk.bf16.vlgmr.msra.gmra.mrb[28].mxu0 %vm576_vm11, %v1804_v50  ;;  %v4623_v42 = vrot.slane %v2102_v29, %v3870_v10  ;;  %v4629_v17 = vrot.slane %v4603_v41, %v3870_v10  ;;  %v2342_v18 = vsel %vm4010_vm15, %v3154_v30, %v2341_v7  ;;  %v4637_v34 = vsel %vm4010_vm15, %v3155_v5, %v2345_v39  ;;  %v3628_v5 = vld [vmem:[%s4852_s3 + $0x170] sm:$0xff]  }
  0x71   : > { %3402 = vmatpush3.bf16.msra.mxu0 %v3610_v12  ;;  %3405 = vmatprep.mubr.msk.bf16.mxu0 %vm3735_vm0, %v3734_v1  ;;  %v4616_v15 = vrot.slane %v2265_v32, %v3870_v10  ;;  %v4641_v19 = vsel %vm4010_vm15, %v3156_v44, %v2349_v45  ;;  %v2354_v47 = vsel %vm4010_vm15, %v3157_v27, %v2353_v35  ;;  %v2524_v3 = vshll.u32 %v2513_v26, 16  ;;  %v3623_v32 = vld [vmem:[%s4852_s3 + $0x148] sm:$0xff]  }
  0x72   : > { %3403 = vmatprep.subr.bf16.mxu0 %v3734_v1  ;;  %3412 = vmatpush3.bf16.msra.mxu1 %v3614_v36  ;;  %v2521_v56 = vor.u32 %v2520_v55, %v2517_v54  ;;  %v2759_v58 = vshrl.u32 %v4629_v17, 16  ;;  %v2431_v20 = vcombine.low %v4398_v46, %v4410_v57  ;;  %v2432_v60 = vcombine.low %v4435_v37, %v4563_v2  ;;  %v3632_v55 = vld [vmem:[%s4852_s3 + $0x190] sm:$0xff]  }
  0x73   : > { %3425 = vmatprep.subr.bf16.mxu1 %v3734_v1  ;;  %v2280_v59 = vcombine.low %v2272_v8, %v4616_v15  ;;  %v2762_v61 = vshll.u32 %v4629_v17, 16  ;;  %v3167_v50 = vrot.slane %v4588_v33, 9  ;;  %v2605_v49 = vrot.slane %v2513_v26, 7  ;;  %v3629_v8 = vld [vmem:[%s4852_s3 + $0x168] sm:$0xff]  }
  0x74   : > { %v4664_v43 = vcombine.high %v4629_v17, %v4629_v17  ;;  %v2761_v16 = vrot.slane %v2759_v58, 6  ;;  %v2117_v46 = vcombine.low %v2109_v21, %v4623_v42  ;;  %v2355_v57 = vcombine.low %v2342_v18, %v4637_v34  ;;  %v3631_v18 = vld [vmem:[%s4852_s3 + $0x180] sm:$0xff]  }
  0x75   : > { %3404 = vmatpush3.bf16.msra.mxu0 %v3613_v52  ;;  %3414 = vmatmul.mubr.msk.bf16.vlgmr.msra.gmra.mrb[32].mxu1 %vm576_vm11, %v2032_v6  ;;  %v2356_v37 = vcombine.low %v4641_v19, %v2354_v47  ;;  %v2764_v12 = vrot.slane %v2762_v61, 7  ;;  %v2522_v38 = vrot.slane %v2521_v56, 2  ;;  %v2526_v11 = vrot.slane %v2524_v3, 7  ;;  %v3624_v52 = vld [vmem:[%s4852_s3 + $0x158] sm:$0xff]  }
  0x76   : > { %3417 = vmatprep.subr.bf16.mxu0 %v3734_v1  ;;  %3426 = vmatpush3.bf16.msra.mxu1 %v3616_v28  ;;  %v2439_v36 = vrot.slane %v2431_v20, %v3870_v10  ;;  %v2446_v63 = vrot.slane %v2432_v60, %v3870_v10  ;;  %v4684_v6 = vsel %vm4010_vm15, %v3167_v50, %v2605_v49  ;;  %v2768_v29 = vshll.u32 %v4664_v43, 16 }
  0x77   : > { %3429 = vmatprep.mubr.msk.bf16.mxu1 %vm3735_vm0, %v3734_v1  ;;  %3427 = vmatprep.subr.bf16.mxu1 %v3734_v1  ;;  %v2765_v9 = vor.u32 %v2764_v12, %v2761_v16  ;;  %v4691_v31 = vrot.slane %v2356_v37, %v3870_v10  ;;  %v2527_v33 = vsel %vm3944_vm10, %v2522_v38, %v2526_v11 }
  0x78   : > { %3406 = vmatmul.mubr.msk.bf16.vlgmr.msra.gmra.mrb[32].mxu0 %vm576_vm11, %v1961_v22  ;;  %v2363_v22 = vrot.slane %v2355_v57, %v3870_v10  ;;  %v2447_v28 = vcombine.low %v2439_v36, %v2446_v63  ;;  %v2607_v30 = vcombine.low %v4637_v34, %v4641_v19  ;;  %v2608_v7 = vcombine.low %v2354_v47, %v4684_v6 }
  0x79   : > { %3418 = vmatpush3.bf16.msra.mxu0 %v3615_v53  ;;  %3421 = vmatprep.mubr.msk.bf16.mxu0 %vm3735_vm0, %v3734_v1  ;;  %v2766_v39 = vrot.slane %v2765_v9, 2  ;;  %v2770_v44 = vrot.slane %v2768_v29, 7  ;;  %v2528_v51 = vcombine.low %v4556_v40, %v4560_v0  ;;  %v2529_v24 = vcombine.low %v4569_v4, %v2527_v33  ;;  %v3625_v53 = vld [vmem:[%s4852_s3 + $0x160] sm:$0xff]   ;;  %v3630_v40 = vld [vmem:[%s4852_s3 + $0x178] sm:$0xff]  }
  0x7a   : > { %3419 = vmatprep.subr.bf16.mxu0 %v3734_v1  ;;  %3428 = vmatpush3.bf16.msra.mxu1 %v3618_v14  ;;  %v2371_v45 = vcombine.low %v2363_v22, %v4691_v31  ;;  %v2615_v27 = vrot.slane %v2607_v30, %v3870_v10  ;;  %v2622_v35 = vrot.slane %v2608_v7, %v3870_v10  ;;  %v3177_v34 = vrot.slane %v4629_v17, 9  ;;  %v3633_v17 = vld [vmem:[%s4852_s3 + $0x188] sm:$0xff]  }
  0x7b   : > { %3441 = vmatprep.subr.bf16.mxu1 %v3734_v1  ;;  %v2771_v0 = vsel %vm3944_vm10, %v2766_v39, %v2770_v44  ;;  %v2536_v4 = vrot.slane %v2528_v51, %v3870_v10  ;;  %v2543_v26 = vrot.slane %v2529_v24, %v3870_v10  ;;  %v2683_v21 = vcombine.low %v4563_v2, %v4603_v41  ;;  %v3634_v2 = vld [vmem:[%s4852_s3 + $0x198] sm:$0xff]  }
  0x7c   : > { %v2623_v48 = vcombine.low %v2615_v27, %v2622_v35  ;;  %v2772_v54 = vcombine.low %v2527_v33, %v2771_v0  ;;  %v2841_v19 = vrot.slane %v4664_v43, 7 }
  0x7d   : > { %3420 = vmatpush3.bf16.msra.mxu0 %v3617_v25  ;;  %3430 = vmatmul.mubr.msk.bf16.vlgmr.msra.gmra.mrb[36].mxu1 %vm576_vm11, %v2280_v59  ;;  %v2544_v14 = vcombine.low %v2536_v4, %v2543_v26  ;;  %v2690_v41 = vrot.slane %v2683_v21, %v3870_v10  ;;  %v3636_v59 = vld [vmem:[%s4852_s3 + $0x1a0] sm:$0xff]  }
  0x7e   : > { %3433 = vmatprep.subr.bf16.mxu0 %v3734_v1  ;;  %3442 = vmatpush3.bf16.msra.mxu1 %v3622_v62  ;;  %v2779_v25 = vrot.slane %v2772_v54, %v3870_v10  ;;  %v2842_v47 = vsel %vm4010_vm15, %v3177_v34, %v2841_v19 }
  0x7f   : > { %3445 = vmatprep.mubr.msk.bf16.mxu1 %vm3735_vm0, %v3734_v1  ;;  %3443 = vmatprep.subr.bf16.mxu1 %v3734_v1  ;;  %v2691_v3 = vcombine.low %v4623_v42, %v2690_v41  ;;  %v2843_v58 = vcombine.low %v4684_v6, %v2842_v47 }
  0x80   : > { %3422 = vmatmul.mubr.msk.bf16.vlgmr.msra.gmra.mrb[36].mxu0 %vm576_vm11, %v2117_v46  ;;  %v2780_v56 = vcombine.low %v4616_v15, %v2779_v25  ;;  %v3637_v15 = vld [vmem:[%s4852_s3 + $0x1a8] sm:$0xff]  }
  0x81   : > { %3434 = vmatpush3.bf16.msra.mxu0 %v3621_v13  ;;  %3437 = vmatprep.mubr.msk.bf16.mxu0 %vm3735_vm0, %v3734_v1  ;;  %v2850_v23 = vrot.slane %v2843_v58, %v3870_v10 }
  0x82   : > { %3435 = vmatprep.subr.bf16.mxu0 %v3734_v1  ;;  %3444 = vmatpush3.bf16.msra.mxu1 %v3624_v52 }
  0x83   : > { %3457 = vmatprep.subr.bf16.mxu1 %v3734_v1  ;;  %v2851_v42 = vcombine.low %v4691_v31, %v2850_v23 }
  0x85   : > { %3436 = vmatpush3.bf16.msra.mxu0 %v3623_v32  ;;  %3446 = vmatmul.mubr.msk.bf16.vlgmr.msra.gmra.mrb[40].mxu1 %vm576_vm11, %v2447_v28 }
  0x86   : > { %3449 = vmatprep.subr.bf16.mxu0 %v3734_v1  ;;  %3458 = vmatpush3.bf16.msra.mxu1 %v3628_v5 }
  0x87   : > { %3461 = vmatprep.mubr.msk.bf16.mxu1 %vm3735_vm0, %v3734_v1  ;;  %3459 = vmatprep.subr.bf16.mxu1 %v3734_v1 }
  0x88   : > { %3438 = vmatmul.mubr.msk.bf16.vlgmr.msra.gmra.mrb[40].mxu0 %vm576_vm11, %v2371_v45 }
  0x89   : > { %3450 = vmatpush3.bf16.msra.mxu0 %v3625_v53  ;;  %3453 = vmatprep.mubr.msk.bf16.mxu0 %vm3735_vm0, %v3734_v1 }
  0x8a   : > { %3451 = vmatprep.subr.bf16.mxu0 %v3734_v1  ;;  %3460 = vmatpush3.bf16.msra.mxu1 %v3630_v40 }
  0x8b   : > { %3473 = vmatprep.subr.bf16.mxu1 %v3734_v1 }
  0x8d   : > { %3452 = vmatpush3.bf16.msra.mxu0 %v3629_v8  ;;  %3462 = vmatmul.mubr.msk.bf16.vlgmr.msra.gmra.mrb[44].mxu1 %vm576_vm11, %v2623_v48 }
  0x8e   : > { %3465 = vmatprep.subr.bf16.mxu0 %v3734_v1  ;;  %3474 = vmatpush3.bf16.msra.mxu1 %v3632_v55 }
  0x8f   : > { %3477 = vmatprep.mubr.msk.bf16.mxu1 %vm3735_vm0, %v3734_v1  ;;  %3475 = vmatprep.subr.bf16.mxu1 %v3734_v1 }
  0x90   : > { %3454 = vmatmul.mubr.msk.bf16.vlgmr.msra.gmra.mrb[44].mxu0 %vm576_vm11, %v2544_v14 }
  0x91   : > { %3466 = vmatpush3.bf16.msra.mxu0 %v3631_v18  ;;  %3469 = vmatprep.mubr.msk.bf16.mxu0 %vm3735_vm0, %v3734_v1 }
  0x92   : > { %3467 = vmatprep.subr.bf16.mxu0 %v3734_v1  ;;  %3476 = vmatpush3.bf16.msra.mxu1 %v3634_v2 }
  0x95   : > { %3468 = vmatpush3.bf16.msra.mxu0 %v3633_v17  ;;  %3478 = vmatmul.mubr.msk.bf16.vlgmr.msra.gmra.mrb[48].mxu1 %vm576_vm11, %v2780_v56 }
  0x96   : > { %3481 = vmatprep.subr.bf16.mxu0 %v3734_v1 }
  0x98   : > { %3470 = vmatmul.mubr.msk.bf16.vlgmr.msra.gmra.mrb[48].mxu0 %vm576_vm11, %v2691_v3 }
  0x99   : > { %3482 = vmatpush3.bf16.msra.mxu0 %v3636_v59  ;;  %3485 = vmatprep.mubr.msk.bf16.mxu0 %vm3735_vm0, %v3734_v1  ;;  %vm2927_vm0 = vcmask 257024  }
  0x9a   : > { %3483 = vmatprep.subr.bf16.mxu0 %v3734_v1 }
  0x9d   : > { %3484 = vmatpush3.bf16.msra.mxu0 %v3637_v15 }
  0xa0   : > { %3486 = vmatmul.mubr.msk.bf16.vlgmr.msra.gmra.mrb[52].mxu0 %vm576_vm11, %v2851_v42 }
 0x107   : > { %v687_v20 = vpop.f32.mrb[0].mxu1 }
 0x108   : > { %v3287_v60 = vpop.f32.mrb[1].mxu1 }
 0x109   : > { %v690_v61 = vpop.f32.mrb[2].mxu1 }
 0x10a   : > { %v3288_v10 = vpop.f32.mrb[3].mxu1 }
 0x10b   : > { %v614_v62 = vpop.f32.mrb[0].mxu0 }
 0x10c   : > { %v688_v50 = vadd.f32 %v687_v20, %v614_v62  ;;  %v3279_v49 = vpop.f32.mrb[1].mxu0 }
 0x10d   : > { %v617_v43 = vpop.f32.mrb[2].mxu0 }
 0x10e   : > { %v691_v16 = vadd.f32 %v690_v61, %v617_v43  ;;  %v3280_v46 = vpop.f32.mrb[3].mxu0 }
 0x110   : > { %v859_v57 = vpop.f32.mrb[4].mxu1 }
 0x111   : > { %v3303_v37 = vpop.f32.mrb[5].mxu1 }
 0x112   : > { %v862_v13 = vpop.f32.mrb[6].mxu1 }
 0x113   : > { %v783_v12 = vpop.f32.mrb[4].mxu0  ;;  %v3304_v11 = vpop.f32.mrb[7].mxu1 }
 0x114   : > { %v790_v1 = vadd.f32 %v783_v12, %v688_v50  ;;  %v3295_v38 = vpop.f32.mrb[5].mxu0 }
 0x115   : > { %v786_v36 = vpop.f32.mrb[6].mxu0 }
 0x116   : > { %v791_v63 = vadd.f32 %v786_v36, %v691_v16  ;;  %v866_v52 = vadd.f32 %v859_v57, %v790_v1  ;;  %v3296_v6 = vpop.f32.mrb[7].mxu0 }
 0x118   : > { %v867_v9 = vadd.f32 %v862_v13, %v791_v63  ;;  %v1035_v29 = vpop.f32.mrb[8].mxu1 }
 0x119   : > { %v3319_v22 = vpop.f32.mrb[9].mxu1 }
 0x11a   : > { %v1038_v32 = vpop.f32.mrb[10].mxu1 }
 0x11b   : > { %v956_v31 = vpop.f32.mrb[8].mxu0  ;;  %v3320_v30 = vpop.f32.mrb[11].mxu1 }
 0x11c   : > { %v963_v33 = vadd.f32 %v956_v31, %v866_v52  ;;  %v3311_v28 = vpop.f32.mrb[9].mxu0 }
 0x11d   : > { %v959_v7 = vpop.f32.mrb[10].mxu0 }
 0x11e   : > { %v964_v5 = vadd.f32 %v959_v7, %v867_v9  ;;  %v1042_v39 = vadd.f32 %v1035_v29, %v963_v33  ;;  %v3312_v44 = vpop.f32.mrb[11].mxu0 }
 0x120   : > { %v1043_v45 = vadd.f32 %v1038_v32, %v964_v5  ;;  %v1192_v51 = vpop.f32.mrb[12].mxu1 }
 0x121   : > { %v3335_v24 = vpop.f32.mrb[13].mxu1 }
 0x122   : > { %v1195_v27 = vpop.f32.mrb[14].mxu1 }
 0x123   : > { %v1103_v53 = vpop.f32.mrb[12].mxu0  ;;  %v3336_v0 = vpop.f32.mrb[15].mxu1 }
 0x124   : > { %v1110_v35 = vadd.f32 %v1103_v53, %v1042_v39  ;;  %v3327_v40 = vpop.f32.mrb[13].mxu0 }
 0x125   : > { %v1106_v4 = vpop.f32.mrb[14].mxu0 }
 0x126   : > { %v1111_v26 = vadd.f32 %v1106_v4, %v1043_v45  ;;  %v1199_v8 = vadd.f32 %v1192_v51, %v1110_v35  ;;  %v3328_v48 = vpop.f32.mrb[15].mxu0 }
 0x128   : > { %v1200_v54 = vadd.f32 %v1195_v27, %v1111_v26  ;;  %v1348_v55 = vpop.f32.mrb[16].mxu1 }
 0x129   : > { %v3351_v14 = vpop.f32.mrb[17].mxu1 }
 0x12a   : > { %v1351_v18 = vpop.f32.mrb[18].mxu1 }
 0x12b   : > { %v1263_v21 = vpop.f32.mrb[16].mxu0  ;;  %v3352_v25 = vpop.f32.mrb[19].mxu1 }
 0x12c   : > { %v1270_v34 = vadd.f32 %v1263_v21, %v1199_v8  ;;  %v3343_v19 = vpop.f32.mrb[17].mxu0 }
 0x12d   : > { %v1266_v2 = vpop.f32.mrb[18].mxu0 }
 0x12e   : > { %v1271_v41 = vadd.f32 %v1266_v2, %v1200_v54  ;;  %v1355_v17 = vadd.f32 %v1348_v55, %v1270_v34  ;;  %v3344_v47 = vpop.f32.mrb[19].mxu0 }
 0x130   : > { %v1356_v56 = vadd.f32 %v1351_v18, %v1271_v41  ;;  %v1602_v3 = vpop.f32.mrb[20].mxu1 }
 0x131   : > { %v3367_v58 = vpop.f32.mrb[21].mxu1 }
 0x132   : > { %v1605_v23 = vpop.f32.mrb[22].mxu1 }
 0x133   : > { %v1511_v59 = vpop.f32.mrb[20].mxu0  ;;  %v3368_v20 = vpop.f32.mrb[23].mxu1 }
 0x134   : > { %v1518_v15 = vadd.f32 %v1511_v59, %v1355_v17  ;;  %v3359_v42 = vpop.f32.mrb[21].mxu0 }
 0x135   : > { %v1514_v60 = vpop.f32.mrb[22].mxu0 }
 0x136   : > { %v1519_v61 = vadd.f32 %v1514_v60, %v1356_v56  ;;  %v1609_v62 = vadd.f32 %v1602_v3, %v1518_v15  ;;  %v3360_v10 = vpop.f32.mrb[23].mxu0 }
 0x138   : > { %v1610_v50 = vadd.f32 %v1605_v23, %v1519_v61  ;;  %v1775_v49 = vpop.f32.mrb[24].mxu1 }
 0x139   : > { %v3383_v43 = vpop.f32.mrb[25].mxu1 }
 0x13a   : > { %v1778_v46 = vpop.f32.mrb[26].mxu1 }
 0x13b   : > { %v1678_v16 = vpop.f32.mrb[24].mxu0  ;;  %v3384_v12 = vpop.f32.mrb[27].mxu1 }
 0x13c   : > { %v1685_v57 = vadd.f32 %v1678_v16, %v1609_v62  ;;  %v3375_v37 = vpop.f32.mrb[25].mxu0 }
 0x13d   : > { %v1681_v13 = vpop.f32.mrb[26].mxu0 }
 0x13e   : > { %v1686_v1 = vadd.f32 %v1681_v13, %v1610_v50  ;;  %v1782_v38 = vadd.f32 %v1775_v49, %v1685_v57  ;;  %v3376_v11 = vpop.f32.mrb[27].mxu0 }
 0x140   : > { %v1783_v36 = vadd.f32 %v1778_v46, %v1686_v1  ;;  %v1922_v63 = vpop.f32.mrb[28].mxu1 }
 0x141   : > { %v3399_v52 = vpop.f32.mrb[29].mxu1 }
 0x142   : > { %v1925_v9 = vpop.f32.mrb[30].mxu1 }
 0x143   : > { %v1854_v6 = vpop.f32.mrb[28].mxu0  ;;  %v3400_v31 = vpop.f32.mrb[31].mxu1 }
 0x144   : > { %v1861_v29 = vadd.f32 %v1854_v6, %v1782_v38  ;;  %v3391_v22 = vpop.f32.mrb[29].mxu0 }
 0x145   : > { %v1857_v32 = vpop.f32.mrb[30].mxu0 }
 0x146   : > { %v1862_v33 = vadd.f32 %v1857_v32, %v1783_v36  ;;  %v1929_v28 = vadd.f32 %v1922_v63, %v1861_v29  ;;  %v3392_v30 = vpop.f32.mrb[31].mxu0 }
 0x148   : > { %v1930_v7 = vadd.f32 %v1925_v9, %v1862_v33  ;;  %v2082_v5 = vpop.f32.mrb[32].mxu1 }
 0x149   : > { %v3415_v39 = vpop.f32.mrb[33].mxu1 }
 0x14a   : > { %v2085_v45 = vpop.f32.mrb[34].mxu1 }
 0x14b   : > { %v2011_v44 = vpop.f32.mrb[32].mxu0  ;;  %v3416_v53 = vpop.f32.mrb[35].mxu1 }
 0x14c   : > { %v2018_v51 = vadd.f32 %v2011_v44, %v1929_v28  ;;  %v3407_v24 = vpop.f32.mrb[33].mxu0  ;;  %v3181_v28 = vld [vmem:[%s4853_s4] ss:$0 sm:$0xff] }
 0x14d   : > { %v2014_v27 = vpop.f32.mrb[34].mxu0 }
 0x14e   : > { %v2019_v35 = vadd.f32 %v2014_v27, %v1930_v7  ;;  %v2089_v40 = vadd.f32 %v2082_v5, %v2018_v51  ;;  %v3408_v0 = vpop.f32.mrb[35].mxu0 }
 0x150   : > { %v2090_v4 = vadd.f32 %v2085_v45, %v2019_v35  ;;  %v2330_v26 = vpop.f32.mrb[36].mxu1 }
 0x151   : > { %v3431_v8 = vpop.f32.mrb[37].mxu1 }
 0x152   : > { %v2333_v54 = vpop.f32.mrb[38].mxu1 }
 0x153   : > { %v2167_v48 = vpop.f32.mrb[36].mxu0  ;;  %v3432_v21 = vpop.f32.mrb[39].mxu1 }
 0x154   : > { %v2174_v55 = vadd.f32 %v2167_v48, %v2089_v40  ;;  %v3423_v14 = vpop.f32.mrb[37].mxu0 }
 0x155   : > { %v2170_v18 = vpop.f32.mrb[38].mxu0 }
 0x156   : > { %v2175_v34 = vadd.f32 %v2170_v18, %v2090_v4  ;;  %v2337_v19 = vadd.f32 %v2330_v26, %v2174_v55  ;;  %v3424_v25 = vpop.f32.mrb[39].mxu0 }
 0x158   : > { %v2338_v2 = vadd.f32 %v2333_v54, %v2175_v34  ;;  %v2497_v41 = vpop.f32.mrb[40].mxu1 }
 0x159   : > { %v3447_v17 = vpop.f32.mrb[41].mxu1 }
 0x15a   : > { %v2500_v56 = vpop.f32.mrb[42].mxu1 }
 0x15b   : > { %v2421_v47 = vpop.f32.mrb[40].mxu0  ;;  %v3448_v59 = vpop.f32.mrb[43].mxu1 }
 0x15c   : > { %v2428_v3 = vadd.f32 %v2421_v47, %v2337_v19  ;;  %v3439_v58 = vpop.f32.mrb[41].mxu0 }
 0x15d   : > { %v2424_v23 = vpop.f32.mrb[42].mxu0 }
 0x15e   : > { %v2429_v15 = vadd.f32 %v2424_v23, %v2338_v2  ;;  %v2504_v42 = vadd.f32 %v2497_v41, %v2428_v3  ;;  %v3440_v20 = vpop.f32.mrb[43].mxu0 }
 0x160   : > { %v2505_v60 = vadd.f32 %v2500_v56, %v2429_v15  ;;  %v2673_v61 = vpop.f32.mrb[44].mxu1 }
 0x161   : > { %v3463_v62 = vpop.f32.mrb[45].mxu1 }
 0x162   : > { %v2676_v50 = vpop.f32.mrb[46].mxu1 }
 0x163   : > { %v2594_v10 = vpop.f32.mrb[44].mxu0  ;;  %v3464_v16 = vpop.f32.mrb[47].mxu1 }
 0x164   : > { %v2601_v49 = vadd.f32 %v2594_v10, %v2504_v42  ;;  %v3455_v43 = vpop.f32.mrb[45].mxu0 }
 0x165   : > { %v2597_v46 = vpop.f32.mrb[46].mxu0 }
 0x166   : > { %v2602_v57 = vadd.f32 %v2597_v46, %v2505_v60  ;;  %v2680_v37 = vadd.f32 %v2673_v61, %v2601_v49  ;;  %v3456_v12 = vpop.f32.mrb[47].mxu0 }
 0x168   : > { %v2681_v13 = vadd.f32 %v2676_v50, %v2602_v57  ;;  %v2830_v1 = vpop.f32.mrb[48].mxu1 }
 0x169   : > { %v3479_v38 = vpop.f32.mrb[49].mxu1 }
 0x16a   : > { %v2833_v36 = vpop.f32.mrb[50].mxu1 }
 0x16b   : > { %v2741_v11 = vpop.f32.mrb[48].mxu0  ;;  %v3480_v6 = vpop.f32.mrb[51].mxu1 }
 0x16c   : > { %v2748_v63 = vadd.f32 %v2741_v11, %v2680_v37  ;;  %v3471_v52 = vpop.f32.mrb[49].mxu0 }
 0x16d   : > { %v2744_v9 = vpop.f32.mrb[50].mxu0 }
 0x16e   : > { %v2749_v29 = vadd.f32 %v2744_v9, %v2681_v13  ;;  %v2837_v22 = vadd.f32 %v2830_v1, %v2748_v63  ;;  %v3472_v31 = vpop.f32.mrb[51].mxu0 }
 0x170   : > { %v2838_v32 = vadd.f32 %v2833_v36, %v2749_v29 }
 0x173   : > { %v2901_v33 = vpop.f32.mrb[52].mxu0 }
 0x174   : > { %v2908_v30 = vadd.f32 %v2901_v33, %v2837_v22  ;;  %v3487_v7 = vpop.f32.mrb[53].mxu0 }
 0x175   : > { %v2904_v5 = vpop.f32.mrb[54].mxu0 }
 0x176   : > { %v2917_v39 = vadd.f32 %v3181_v28, %v2908_v30  ;;  %v2909_v44 = vadd.f32 %v2904_v5, %v2838_v32  ;;  %v3488_v45 = vpop.f32.mrb[55].mxu0 }
 0x178   : > { %v3190_v51 = vpack.c.bf16 %v2917_v39, %v2917_v39  ;;  %v2918_v24 = vadd.f32 %v3181_v28, %v2909_v44 }
 0x17a   : > { %2928 = vst.msk [vmem:[%s301_s9] sm:$0xf] %vm2927_vm0, %v3190_v51  ;;  %v3191_v53 = vpack.c.bf16 %v2918_v24, %v2918_v24 }
 0x17c   : > { %2929 = vst.msk [vmem:[%s301_s9 + $0x4] sm:$0xf] %vm2927_vm0, %v3191_v53 }
 0x17d   : > { %3651 = shalt.err (!%p3648_p10)
}
 0x17e   : > { %s3652_s10 = scalar_lea.hbm %s4793_s27, 128  ;;  %s3656_s8 = scalar_lea.hbm %s4854_s5, 1024 }
 0x17f   : > { %p3653_p11 = scmp.ne.s32.totalorder %s4793_s27, %s3652_s10  ;;  %p3657_p0 = scmp.lt.u32.totalorder %s4793_s27, %s4854_s5 }
 0x180   : > { %p3658_p1 = scmp.lt.u32.totalorder %s3656_s8, %s3652_s10  ;;  %p3660_p4 = scmp.lt.u32.totalorder %s3652_s10, %s4793_s27 }
 0x181   : > { %p3654_p12 = pnand %p3653_p11, %p3821_p3 }
 0x182   : > { %p3659_p2 = por %p3658_p1, %p3657_p0 }
 0x183   : > { %p3655_p13 = pneg %p3654_p12 }
 0x184   : > { %p3661_p5 = por %p3660_p4, %p3659_p2 }
 0x186   : > { %p3662_p6 = pnand %p3661_p5, %p3655_p13 }
 0x188   : > { %3665 = shalt.err (!%p3662_p6)
}
 0x189   : > { %s3738_s22 = smov 64   ;;  %s3739_s12 = smov 4  }
 0x18a   : > { %3493 = dma.vmem_to_hbm [thread:$0]  (%p3821_p3), %s4795_s15, 128, %s4793_s27, %s4797_s30, %s3738_s22, %s3738_s22, %s3739_s12  }
 0x18b PF: > { %p3499_p7 = scmp.ge.s32.totalorder %s3732_s25, 2  ;;  %s2961_s13 = sand.u32 1, %s3704_s18  }
 0x18c   : > { %s2962_s14 = scalar_lea.sflag [#allocation3], %s2961_s13 }
 0x18d   : > { %p3496_p9 = pnand %p3499_p7, %p3830_p8 }
 0x18f   : > { %3699 = dma.done.wait (!%p3496_p9), %s2962_s14, 128  }
 0x190   : > { %3701 = vsyncadd (!%p3496_p9), %s2962_s14, 4294967168  ;;  %s18_s25 = sadd.s32 1, %s3732_s25   ;;  %s4863_s18 = smov %s3708_s19 }
 0x191   : > { %p15_p10 = scmp.ge.s32.totalorder %s18_s25, 10   ;;  %s4864_s19 = smov %s3712_s20 }
 0x192   : > { %s4865_s20 = smov %s3839_s11  ;;  %s4866_s21 = smov %s3724_s23 }
 0x193   : > { %s4867_s22 = smov %s3728_s24  ;;  %s4868_s23 = smov %s4871_s28 }
 0x194   : > { %s4869_s24 = smov %s4875_s29  ;;  %17 = sbr.rel (!%p15_p10) target bundleno = 5 (0x5), region = 81 }
 0x19b   :  { %2967 = vsyncpa [#allocation3], 1 }
 0x19c   :  { %2969 = vsyncpa [#allocation3 + $0x1], 1 }

</bundles_post_ra>
